<compile_context>
chip_gen: v6e
topology: v6e:2x2x1
jax: 0.10.0
libtpu: 0.0.40
codegen_flags: <defaults>
</compile_context>

<pallas_src>
import math

import jax
import jax.numpy as jnp
from jax import lax
from jax.experimental import pallas as pl
from jax.experimental.pallas import tpu as pltpu

STAGE_NUM = 3
BN_EPS = 1e-5
_VMEM_LIMIT = 32 * 1024 * 1024   # >= v5e scoped default, <= v7x physical


def _softmax_lastdim(s):
    """Softmax over the last (lane) dim; the divide goes to the EUP."""
    s = s - jnp.max(s, axis=-1, keepdims=True)
    e = jnp.exp(s)
    return e * pl.reciprocal(jnp.sum(e, axis=-1, keepdims=True), approx=True)


# ---------------------------------------------------------------- conv1 (1x1)
def _conv1_kernel(x_ref, w1_ref, b1_ref, x1_ref):
    # x_ref: (1, tn, C) f32 ; w1_ref: (C, C) bf16 ; b1_ref: (1, C) f32
    x = x_ref[0].astype(jnp.bfloat16)
    y = jnp.dot(x, w1_ref[...], preferred_element_type=jnp.float32) + b1_ref[...]
    x1_ref[0] = y.astype(x1_ref.dtype)


# ------------------------------------------------------------- one EM stage
def _em_stage_kernel(x1_ref, muT_ref, muT_out_ref, xzT_acc, cs_acc):
    """Tiled reduction over the pixel axis N.

    x1_ref      : (1, tn, C) bf16  conv1 activations for this N-tile
    muT_ref     : (1, K, C)  f32   current bases (lane-dense over C)
    muT_out_ref : (1, K, C)  f32   updated bases (written on the last N-tile)
    xzT_acc     : (K, C)     f32   accumulates z^T @ x1
    cs_acc      : (K, 1)     f32   accumulates per-basis responsibility sums
    """
    nt = pl.program_id(1)

    @pl.when(nt == 0)
    def _init():
        xzT_acc[...] = jnp.zeros_like(xzT_acc)
        cs_acc[...] = jnp.zeros_like(cs_acc)

    x1 = x1_ref[0]                                    # (tn, C) bf16
    muT = muT_ref[0].astype(jnp.bfloat16)             # (K, C)

    # z = softmax_K(x1 @ mu): contract over C (dim 1 of both); any operand
    # transpose falls on the small (K, C) bases, never on the big tile.
    z = _softmax_lastdim(
        lax.dot_general(x1, muT, (((1,), (1,)), ((), ())),
                        preferred_element_type=jnp.float32))      # (tn, K) f32

    ones = jnp.ones((z.shape[0], 1), jnp.float32)
    cs_acc[...] += lax.dot_general(z, ones, (((0,), (0,)), ((), ())),
                                   preferred_element_type=jnp.float32)  # (K, 1)
    # xz^T += z^T @ x1 : transpose burden on the small (tn, K) z.
    xzT_acc[...] += lax.dot_general(z.astype(jnp.bfloat16), x1,
                                    (((0,), (0,)), ((), ())),
                                    preferred_element_type=jnp.float32)  # (K, C)

    @pl.when(nt == pl.num_programs(1) - 1)
    def _finalize():
        # column normalization of z commutes with the mu-update matmul
        mu_new = xzT_acc[...] * pl.reciprocal(1e-6 + cs_acc[...], approx=True)
        norm = jnp.sqrt(jnp.sum(mu_new * mu_new, axis=1, keepdims=True))  # (K, 1)
        mu_new = mu_new * pl.reciprocal(1e-6 + norm, approx=True)
        muT_out_ref[0] = mu_new


# --------------------- reconstruction + conv2 (BN folded) + residual + ReLU
def _epilogue_kernel(x_ref, x1_ref, muT_pre_ref, muT_fin_ref, w2_ref, b2_ref,
                     out_ref):
    x1 = x1_ref[0]                                    # (tn, C) bf16
    muT_pre = muT_pre_ref[0].astype(jnp.bfloat16)     # (K, C) bases before final update
    muT_fin = muT_fin_ref[0].astype(jnp.bfloat16)     # (K, C) final bases

    # recompute the final-stage responsibilities (cheaper than storing (N, K))
    z = _softmax_lastdim(
        lax.dot_general(x1, muT_pre, (((1,), (1,)), ((), ())),
                        preferred_element_type=jnp.float32))      # (tn, K)

    # reconstruction (mu @ z^T)^T in channel-last form = z @ mu^T = z @ muT
    x_rec = jnp.dot(z.astype(jnp.bfloat16), muT_fin,
                    preferred_element_type=jnp.float32)           # (tn, C)
    x_rec = jnp.maximum(x_rec, 0.0)

    # conv2 (1x1, no bias) with eval-mode BatchNorm folded into w2 / b2
    x2 = jnp.dot(x_rec.astype(jnp.bfloat16), w2_ref[...],
                 preferred_element_type=jnp.float32) + b2_ref[...]

    # residual add (re-read from the input ref only here) + ReLU
    out_ref[0] = jnp.maximum(x2 + x_ref[0], 0.0).astype(out_ref.dtype)


# ------------------------------------------------------------------ wrapper
def _pick_tile_n(n):
    """Largest of {512, 256, 128} dividing n (prefer >= 2 tiles), else n."""
    fallback = None
    for t in (512, 256, 128):
        if n % t == 0:
            if fallback is None:
                fallback = t
            if n // t >= 2:
                return t
    return fallback if fallback is not None else n


def emau_forward(x_nchw, params, stage_num=STAGE_NUM):
    """EMAU forward (eval). NCHW in -> (NCHW out, (B, C, K) bases)."""
    b, c, h, w = x_nchw.shape
    n = h * w
    k = params["mu"].shape[-1]
    tn = _pick_tile_n(n)
    n_tiles = n // tn

    # TODO(synk): a channel-last surrounding model would avoid these two
    # full-tensor HBM transposes around the kernels.
    x_flat = jnp.transpose(x_nchw.reshape(b, c, n), (0, 2, 1)).astype(jnp.float32)

    w1 = params["w1"].astype(jnp.bfloat16)                        # (c_in, c_out)
    b1 = params["b1"].astype(jnp.float32)                         # (1, c)
    # fold eval-mode BatchNorm into conv2
    scale = params["gamma"] * lax.rsqrt(params["rvar"] + BN_EPS)  # (1, c)
    w2f = (params["w2"] * scale).astype(jnp.bfloat16)             # (c_in, c_out)
    b2f = (params["beta"] - params["rmean"] * scale).astype(jnp.float32)

    par = pltpu.CompilerParams(dimension_semantics=("parallel", "parallel"),
                               vmem_limit_bytes=_VMEM_LIMIT)
    red = pltpu.CompilerParams(dimension_semantics=("parallel", "arbitrary"),
                               vmem_limit_bytes=_VMEM_LIMIT)

    # ---- conv1: x1 = x @ w1 + b1, kept in bf16 for the later MXU stages ----
    x1 = pl.pallas_call(
        _conv1_kernel,
        out_shape=jax.ShapeDtypeStruct((b, n, c), jnp.bfloat16),
        grid_spec=pltpu.PrefetchScalarGridSpec(
            num_scalar_prefetch=0,
            grid=(b, n_tiles),
            in_specs=[
                pl.BlockSpec((1, tn, c), lambda i, j: (i, j, 0)),
                pl.BlockSpec((c, c), lambda i, j: (0, 0)),
                pl.BlockSpec((1, c), lambda i, j: (0, 0)),
            ],
            out_specs=pl.BlockSpec((1, tn, c), lambda i, j: (i, j, 0)),
        ),
        compiler_params=par,
    )(x_flat, w1, b1)

    # ---- EM iterations: each stage is one tiled reduction over N ----
    em_stage = pl.pallas_call(
        _em_stage_kernel,
        out_shape=jax.ShapeDtypeStruct((b, k, c), jnp.float32),
        grid_spec=pltpu.PrefetchScalarGridSpec(
            num_scalar_prefetch=0,
            grid=(b, n_tiles),
            in_specs=[
                pl.BlockSpec((1, tn, c), lambda i, j: (i, j, 0)),   # x1 tile
                pl.BlockSpec((1, k, c), lambda i, j: (i, 0, 0)),    # mu^T per batch
            ],
            out_specs=pl.BlockSpec((1, k, c), lambda i, j: (i, 0, 0)),
            scratch_shapes=[
                pltpu.VMEM((k, c), jnp.float32),    # z^T @ x1 accumulator
                pltpu.VMEM((k, 1), jnp.float32),    # responsibility column sums
            ],
        ),
        compiler_params=red,
    )

    mu0T = jnp.broadcast_to(
        jnp.transpose(params["mu"].astype(jnp.float32), (0, 2, 1)), (b, k, c))
    mus = [mu0T]
    for _ in range(stage_num):
        mus.append(em_stage(x1, mus[-1]))
    muT_fin = mus[-1]          # bases after the last update
    muT_pre = mus[-2]          # bases that produced the final z in the loop

    # ---- reconstruction + conv2(+BN) + residual + ReLU ----
    out_flat = pl.pallas_call(
        _epilogue_kernel,
        out_shape=jax.ShapeDtypeStruct((b, n, c), jnp.float32),
        grid_spec=pltpu.PrefetchScalarGridSpec(
            num_scalar_prefetch=0,
            grid=(b, n_tiles),
            in_specs=[
                pl.BlockSpec((1, tn, c), lambda i, j: (i, j, 0)),   # x (residual)
                pl.BlockSpec((1, tn, c), lambda i, j: (i, j, 0)),   # x1
                pl.BlockSpec((1, k, c), lambda i, j: (i, 0, 0)),    # mu_pre^T
                pl.BlockSpec((1, k, c), lambda i, j: (i, 0, 0)),    # mu_fin^T
                pl.BlockSpec((c, c), lambda i, j: (0, 0)),          # w2 (BN folded)
                pl.BlockSpec((1, c), lambda i, j: (0, 0)),          # b2 (BN folded)
            ],
            out_specs=pl.BlockSpec((1, tn, c), lambda i, j: (i, j, 0)),
        ),
        compiler_params=par,
    )(x_flat, x1, muT_pre, muT_fin, w2f, b2f)

    out_nchw = jnp.transpose(out_flat, (0, 2, 1)).reshape(b, c, h, w)
    mu_out = jnp.transpose(muT_fin, (0, 2, 1))           # (b, c, k) PyTorch layout
    return out_nchw, mu_out


# --------------------------------------------------------------- references
def emau_reference(x_nchw, p):
    """Pure-JAX f32 reference mirroring the PyTorch forward (eval mode)."""
    b, c, h, w = x_nchw.shape
    n = h * w
    k = p["mu"].shape[-1]
    idn = x_nchw.reshape(b, c, n)
    x = jnp.einsum("bcn,cd->bdn", idn, p["w1"]) + p["b1"].reshape(1, c, 1)
    mu = jnp.broadcast_to(p["mu"], (b, c, k))
    z = None
    for _ in range(STAGE_NUM):
        xt = jnp.transpose(x, (0, 2, 1))                  # (b, n, c)
        z = jnp.einsum("bnc,bck->bnk", xt, mu)
        z = jax.nn.softmax(z, axis=2)
        z_ = z / (1e-6 + jnp.sum(z, axis=1, keepdims=True))
        mu = jnp.einsum("bcn,bnk->bck", x, z_)
        mu = mu / (1e-6 + jnp.linalg.norm(mu, axis=1, keepdims=True))
    xr = jnp.einsum("bck,bnk->bcn", mu, z)
    xr = jnp.maximum(xr, 0.0)
    x2 = jnp.einsum("bcn,cd->bdn", xr, p["w2"])
    bn = ((x2 - p["rmean"].reshape(1, c, 1))
          * lax.rsqrt(p["rvar"].reshape(1, c, 1) + BN_EPS)
          * p["gamma"].reshape(1, c, 1) + p["beta"].reshape(1, c, 1))
    out = jnp.maximum(bn + idn, 0.0).reshape(b, c, h, w)
    return out, mu


def init_params(key, c, k):
    k_mu, k_w1, k_b1, k_w2 = jax.random.split(key, 4)
    mu = jax.random.normal(k_mu, (1, c, k), jnp.float32) * math.sqrt(2.0 / k)
    mu = mu / (1e-6 + jnp.linalg.norm(mu, axis=1, keepdims=True))
    w1 = jax.random.normal(k_w1, (c, c), jnp.float32) * math.sqrt(2.0 / c)
    b1 = (jax.random.uniform(k_b1, (1, c), jnp.float32) - 0.5) / math.sqrt(c)
    w2 = jax.random.normal(k_w2, (c, c), jnp.float32) * math.sqrt(2.0 / c)
    return {
        "mu": mu, "w1": w1, "b1": b1, "w2": w2,
        "gamma": jnp.ones((1, c), jnp.float32),
        "beta": jnp.zeros((1, c), jnp.float32),
        "rmean": jnp.zeros((1, c), jnp.float32),
        "rvar": jnp.ones((1, c), jnp.float32),
    }


if __name__ == "__main__":
    B, C, H, W, K = 2, 4, 16, 16, 8
    key = jax.random.PRNGKey(0)
    k_x, k_p = jax.random.split(key)
    x = jax.random.normal(k_x, (B, C, H, W), jnp.float32)
    params = init_params(k_p, C, K)

    fwd = jax.jit(emau_forward)
    out, mu_out = fwd(x, params)
    out = jax.block_until_ready(out)
    mu_out = jax.block_until_ready(mu_out)

    ref_out, ref_mu = emau_reference(x, params)
    assert out.shape == (B, C, H, W) and mu_out.shape == (B, C, K)
    # bf16 MXU operands + EUP approx reciprocals -> looser tolerance vs f32 ref
    err_out = float(jnp.max(jnp.abs(out - ref_out)))
    err_mu = float(jnp.max(jnp.abs(mu_out - ref_mu)))
    assert jnp.allclose(out, ref_out, rtol=5e-2, atol=5e-2), err_out
    assert jnp.allclose(mu_out, ref_mu, rtol=5e-2, atol=5e-2), err_mu

    print("KERNEL_OK")
</pallas_src>

<mosaic_0001>
module attributes {stable_mosaic.version = 11 : i64} {
  func.func @_conv1_kernel(%arg0: i32, %arg1: i32, %arg2: memref<1x128x4xf32, #tpu.memory_space<vmem>>, %arg3: memref<4x4xbf16, #tpu.memory_space<vmem>>, %arg4: memref<1x4xf32, #tpu.memory_space<vmem>>, %arg5: memref<1x128x4xbf16, #tpu.memory_space<vmem>>) attributes {dimension_semantics = [#tpu.dimension_semantics<parallel>, #tpu.dimension_semantics<parallel>], iteration_bounds = array<i64: 2, 2>, scalar_prefetch = 0 : i64, scratch_operands = 0 : i64, tpu.core_type = #tpu.core_type<tc>, window_params = [{transform_indices = @transform_0, window_bounds = array<i64: 1, 128, 4>}, {pipeline_mode = #tpu.pipeline_mode<synchronous>, transform_indices = @transform_1, window_bounds = array<i64: 4, 4>}, {pipeline_mode = #tpu.pipeline_mode<synchronous>, transform_indices = @transform_2, window_bounds = array<i64: 1, 4>}, {transform_indices = @transform_3, window_bounds = array<i64: 1, 128, 4>}]} {
    %c0 = arith.constant 0 : index
    %c0_0 = arith.constant 0 : index
    %c0_1 = arith.constant 0 : index
    %0 = vector.load %arg2[%c0, %c0_0, %c0_1] : memref<1x128x4xf32, #tpu.memory_space<vmem>>, vector<1x128x4xf32>
    %1 = vector.shape_cast %0 : vector<1x128x4xf32> to vector<128x4xf32>
    %2 = arith.truncf %1 : vector<128x4xf32> to vector<128x4xbf16>
    %c0_2 = arith.constant 0 : index
    %c0_3 = arith.constant 0 : index
    %3 = vector.load %arg3[%c0_2, %c0_3] : memref<4x4xbf16, #tpu.memory_space<vmem>>, vector<4x4xbf16>
    %cst = arith.constant dense<0.000000e+00> : vector<128x4xf32>
    %4 = tpu.matmul %2, %3, %cst {dimension_numbers = #tpu.dot_dimension_numbers<[1], [0], [0], [1], [0, 0, 1, 1], [], []>} : vector<128x4xbf16>, vector<4x4xbf16>, vector<128x4xf32> -> vector<128x4xf32>
    %c0_4 = arith.constant 0 : index
    %c0_5 = arith.constant 0 : index
    %5 = vector.load %arg4[%c0_4, %c0_5] : memref<1x4xf32, #tpu.memory_space<vmem>>, vector<1x4xf32>
    %6 = vector.broadcast %5 : vector<1x4xf32> to vector<128x4xf32>
    %7 = arith.addf %4, %6 : vector<128x4xf32>
    %8 = arith.truncf %7 : vector<128x4xf32> to vector<128x4xbf16>
    %c0_6 = arith.constant 0 : index
    %c0_7 = arith.constant 0 : index
    %c0_8 = arith.constant 0 : index
    %9 = vector.load %arg5[%c0_6, %c0_7, %c0_8] : memref<1x128x4xbf16, #tpu.memory_space<vmem>>, vector<1x128x4xbf16>
    %10 = vector.shape_cast %9 : vector<1x128x4xbf16> to vector<128x4xbf16>
    %11 = vector.shape_cast %8 : vector<128x4xbf16> to vector<1x128x4xbf16>
    tpu.vector_store %arg5[%c0_6, %c0_7, %c0_8], %11 {strides = array<i32>} : memref<1x128x4xbf16, #tpu.memory_space<vmem>>, vector<1x128x4xbf16>,
    return
  }
  func.func @transform_0(%arg0: i32, %arg1: i32) -> (i32, i32, i32) {
    %c0_i32 = arith.constant 0 : i32
    %c0_i32_0 = arith.constant 0 : i32
    return %arg0, %arg1, %c0_i32 : i32, i32, i32
  }
  func.func @transform_1(%arg0: i32, %arg1: i32) -> (i32, i32) {
    %c0_i32 = arith.constant 0 : i32
    %c0_i32_0 = arith.constant 0 : i32
    %c0_i32_1 = arith.constant 0 : i32
    return %c0_i32, %c0_i32_0 : i32, i32
  }
  func.func @transform_2(%arg0: i32, %arg1: i32) -> (i32, i32) {
    %c0_i32 = arith.constant 0 : i32
    %c0_i32_0 = arith.constant 0 : i32
    %c0_i32_1 = arith.constant 0 : i32
    return %c0_i32, %c0_i32_0 : i32, i32
  }
  func.func @transform_3(%arg0: i32, %arg1: i32) -> (i32, i32, i32) {
    %c0_i32 = arith.constant 0 : i32
    %c0_i32_0 = arith.constant 0 : i32
    return %arg0, %arg1, %c0_i32 : i32, i32, i32
  }
}

module attributes {stable_mosaic.version = 11 : i64} {
  func.func @_em_stage_kernel(%arg0: i32, %arg1: i32, %arg2: memref<1x128x4xbf16, #tpu.memory_space<vmem>>, %arg3: memref<1x8x4xf32, #tpu.memory_space<vmem>>, %arg4: memref<1x8x4xf32, #tpu.memory_space<vmem>>, %arg5: memref<8x4xf32, #tpu.memory_space<vmem>>, %arg6: memref<8x1xf32, #tpu.memory_space<vmem>>) attributes {dimension_semantics = [#tpu.dimension_semantics<parallel>, #tpu.dimension_semantics<arbitrary>], iteration_bounds = array<i64: 2, 2>, scalar_prefetch = 0 : i64, scratch_operands = 2 : i64, tpu.core_type = #tpu.core_type<tc>, window_params = [{transform_indices = @transform_0, window_bounds = array<i64: 1, 128, 4>}, {transform_indices = @transform_1, window_bounds = array<i64: 1, 8, 4>}, {transform_indices = @transform_2, window_bounds = array<i64: 1, 8, 4>}]} {
    %c0_i32 = arith.constant 0 : i32
    %0 = arith.cmpi eq, %arg1, %c0_i32 : i32
    %1 = arith.extui %0 : i1 to i32
    %c0_i32_0 = arith.constant 0 : i32
    %2 = arith.cmpi ne, %1, %c0_i32_0 : i32
    scf.if %2 {
      %cst_20 = arith.constant 0.000000e+00 : f32
      %32 = vector.broadcast %cst_20 : f32 to vector<8x4xf32>
      %c0_21 = arith.constant 0 : index
      %c0_22 = arith.constant 0 : index
      %33 = vector.load %arg5[%c0_21, %c0_22] : memref<8x4xf32, #tpu.memory_space<vmem>>, vector<8x4xf32>
      tpu.vector_store %arg5[%c0_21, %c0_22], %32 {strides = array<i32>} : memref<8x4xf32, #tpu.memory_space<vmem>>, vector<8x4xf32>,
      %cst_23 = arith.constant 0.000000e+00 : f32
      %34 = vector.broadcast %cst_23 : f32 to vector<8x1xf32>
      %c0_24 = arith.constant 0 : index
      %c0_25 = arith.constant 0 : index
      %35 = vector.load %arg6[%c0_24, %c0_25] : memref<8x1xf32, #tpu.memory_space<vmem>>, vector<8x1xf32>
      tpu.vector_store %arg6[%c0_24, %c0_25], %34 {strides = array<i32>} : memref<8x1xf32, #tpu.memory_space<vmem>>, vector<8x1xf32>,
    } else {
    }
    %c0 = arith.constant 0 : index
    %c0_1 = arith.constant 0 : index
    %c0_2 = arith.constant 0 : index
    %3 = vector.load %arg2[%c0, %c0_1, %c0_2] : memref<1x128x4xbf16, #tpu.memory_space<vmem>>, vector<1x128x4xbf16>
    %4 = vector.shape_cast %3 : vector<1x128x4xbf16> to vector<128x4xbf16>
    %c0_3 = arith.constant 0 : index
    %c0_4 = arith.constant 0 : index
    %c0_5 = arith.constant 0 : index
    %5 = vector.load %arg3[%c0_3, %c0_4, %c0_5] : memref<1x8x4xf32, #tpu.memory_space<vmem>>, vector<1x8x4xf32>
    %6 = vector.shape_cast %5 : vector<1x8x4xf32> to vector<8x4xf32>
    %7 = arith.truncf %6 : vector<8x4xf32> to vector<8x4xbf16>
    %cst = arith.constant dense<0.000000e+00> : vector<128x8xf32>
    %8 = tpu.matmul %4, %7, %cst {dimension_numbers = #tpu.dot_dimension_numbers<[1], [1], [0], [0], [0, 0, 1, 0], [], []>} : vector<128x4xbf16>, vector<8x4xbf16>, vector<128x8xf32> -> vector<128x8xf32>
    %cst_6 = arith.constant dense<0xFF800000> : vector<128xf32>
    %9 = vector.multi_reduction <maximumf>, %8, %cst_6 [1] : vector<128x8xf32> to vector<128xf32>
    %10 = vector.shape_cast %9 : vector<128xf32> to vector<128x1xf32>
    %11 = vector.broadcast %10 : vector<128x1xf32> to vector<128x8xf32>
    %12 = arith.subf %8, %11 : vector<128x8xf32>
    %13 = math.exp %12 : vector<128x8xf32>
    %cst_7 = arith.constant dense<0.000000e+00> : vector<128xf32>
    %14 = vector.multi_reduction <add>, %13, %cst_7 [1] : vector<128x8xf32> to vector<128xf32>
    %15 = vector.shape_cast %14 : vector<128xf32> to vector<128x1xf32>
    %16 = tpu.reciprocal %15 {approx = true} : vector<128x1xf32> -> vector<128x1xf32>
    %17 = vector.broadcast %16 : vector<128x1xf32> to vector<128x8xf32>
    %18 = arith.mulf %13, %17 : vector<128x8xf32>
    %cst_8 = arith.constant 1.000000e+00 : f32
    %19 = vector.broadcast %cst_8 : f32 to vector<128x1xf32>
    %c0_9 = arith.constant 0 : index
    %c0_10 = arith.constant 0 : index
    %20 = vector.load %arg6[%c0_9, %c0_10] : memref<8x1xf32, #tpu.memory_space<vmem>>, vector<8x1xf32>
    %cst_11 = arith.constant dense<0.000000e+00> : vector<8x1xf32>
    %21 = tpu.matmul %18, %19, %cst_11 {dimension_numbers = #tpu.dot_dimension_numbers<[0], [0], [1], [1], [0, 1, 1, 1], [], []>} : vector<128x8xf32>, vector<128x1xf32>, vector<8x1xf32> -> vector<8x1xf32>
    %22 = arith.addf %20, %21 : vector<8x1xf32>
    %c0_12 = arith.constant 0 : index
    %c0_13 = arith.constant 0 : index
    %23 = vector.load %arg6[%c0_12, %c0_13] : memref<8x1xf32, #tpu.memory_space<vmem>>, vector<8x1xf32>
    tpu.vector_store %arg6[%c0_12, %c0_13], %22 {strides = array<i32>} : memref<8x1xf32, #tpu.memory_space<vmem>>, vector<8x1xf32>,
    %c0_14 = arith.constant 0 : index
    %c0_15 = arith.constant 0 : index
    %24 = vector.load %arg5[%c0_14, %c0_15] : memref<8x4xf32, #tpu.memory_space<vmem>>, vector<8x4xf32>
    %25 = arith.truncf %18 : vector<128x8xf32> to vector<128x8xbf16>
    %cst_16 = arith.constant dense<0.000000e+00> : vector<8x4xf32>
    %26 = tpu.matmul %25, %4, %cst_16 {dimension_numbers = #tpu.dot_dimension_numbers<[0], [0], [1], [1], [0, 1, 1, 1], [], []>} : vector<128x8xbf16>, vector<128x4xbf16>, vector<8x4xf32> -> vector<8x4xf32>
    %27 = arith.addf %24, %26 : vector<8x4xf32>
    %c0_17 = arith.constant 0 : index
    %c0_18 = arith.constant 0 : index
    %28 = vector.load %arg5[%c0_17, %c0_18] : memref<8x4xf32, #tpu.memory_space<vmem>>, vector<8x4xf32>
    tpu.vector_store %arg5[%c0_17, %c0_18], %27 {strides = array<i32>} : memref<8x4xf32, #tpu.memory_space<vmem>>, vector<8x4xf32>,
    %c1_i32 = arith.constant 1 : i32
    %29 = arith.cmpi eq, %arg1, %c1_i32 : i32
    %30 = arith.extui %29 : i1 to i32
    %c0_i32_19 = arith.constant 0 : i32
    %31 = arith.cmpi ne, %30, %c0_i32_19 : i32
    scf.if %31 {
      %c0_20 = arith.constant 0 : index
      %c0_21 = arith.constant 0 : index
      %32 = vector.load %arg5[%c0_20, %c0_21] : memref<8x4xf32, #tpu.memory_space<vmem>>, vector<8x4xf32>
      %c0_22 = arith.constant 0 : index
      %c0_23 = arith.constant 0 : index
      %33 = vector.load %arg6[%c0_22, %c0_23] : memref<8x1xf32, #tpu.memory_space<vmem>>, vector<8x1xf32>
      %cst_24 = arith.constant 9.99999997E-7 : f32
      %34 = vector.broadcast %cst_24 : f32 to vector<8x1xf32>
      %35 = arith.addf %34, %33 : vector<8x1xf32>
      %36 = tpu.reciprocal %35 {approx = true} : vector<8x1xf32> -> vector<8x1xf32>
      %37 = vector.broadcast %36 : vector<8x1xf32> to vector<8x4xf32>
      %38 = arith.mulf %32, %37 : vector<8x4xf32>
      %39 = arith.mulf %38, %38 : vector<8x4xf32>
      %cst_25 = arith.constant dense<0.000000e+00> : vector<8xf32>
      %40 = vector.multi_reduction <add>, %39, %cst_25 [1] : vector<8x4xf32> to vector<8xf32>
      %41 = vector.shape_cast %40 : vector<8xf32> to vector<8x1xf32>
      %42 = math.sqrt %41 : vector<8x1xf32>
      %cst_26 = arith.constant 9.99999997E-7 : f32
      %43 = vector.broadcast %cst_26 : f32 to vector<8x1xf32>
      %44 = arith.addf %43, %42 : vector<8x1xf32>
      %45 = tpu.reciprocal %44 {approx = true} : vector<8x1xf32> -> vector<8x1xf32>
      %46 = vector.broadcast %45 : vector<8x1xf32> to vector<8x4xf32>
      %47 = arith.mulf %38, %46 : vector<8x4xf32>
      %c0_27 = arith.constant 0 : index
      %c0_28 = arith.constant 0 : index
      %c0_29 = arith.constant 0 : index
      %48 = vector.load %arg4[%c0_27, %c0_28, %c0_29] : memref<1x8x4xf32, #tpu.memory_space<vmem>>, vector<1x8x4xf32>
      %49 = vector.shape_cast %48 : vector<1x8x4xf32> to vector<8x4xf32>
      %50 = vector.shape_cast %47 : vector<8x4xf32> to vector<1x8x4xf32>
      tpu.vector_store %arg4[%c0_27, %c0_28, %c0_29], %50 {strides = array<i32>} : memref<1x8x4xf32, #tpu.memory_space<vmem>>, vector<1x8x4xf32>,
    } else {
    }
    return
  }
  func.func @transform_0(%arg0: i32, %arg1: i32) -> (i32, i32, i32) {
    %c0_i32 = arith.constant 0 : i32
    %c0_i32_0 = arith.constant 0 : i32
    return %arg0, %arg1, %c0_i32 : i32, i32, i32
  }
  func.func @transform_1(%arg0: i32, %arg1: i32) -> (i32, i32, i32) {
    %c0_i32 = arith.constant 0 : i32
    %c0_i32_0 = arith.constant 0 : i32
    %c0_i32_1 = arith.constant 0 : i32
    return %arg0, %c0_i32, %c0_i32_0 : i32, i32, i32
  }
  func.func @transform_2(%arg0: i32, %arg1: i32) -> (i32, i32, i32) {
    %c0_i32 = arith.constant 0 : i32
    %c0_i32_0 = arith.constant 0 : i32
    %c0_i32_1 = arith.constant 0 : i32
    return %arg0, %c0_i32, %c0_i32_0 : i32, i32, i32
  }
}

module attributes {stable_mosaic.version = 11 : i64} {
  func.func @_epilogue_kernel(%arg0: i32, %arg1: i32, %arg2: memref<1x128x4xf32, #tpu.memory_space<vmem>>, %arg3: memref<1x128x4xbf16, #tpu.memory_space<vmem>>, %arg4: memref<1x8x4xf32, #tpu.memory_space<vmem>>, %arg5: memref<1x8x4xf32, #tpu.memory_space<vmem>>, %arg6: memref<4x4xbf16, #tpu.memory_space<vmem>>, %arg7: memref<1x4xf32, #tpu.memory_space<vmem>>, %arg8: memref<1x128x4xf32, #tpu.memory_space<vmem>>) attributes {dimension_semantics = [#tpu.dimension_semantics<parallel>, #tpu.dimension_semantics<parallel>], iteration_bounds = array<i64: 2, 2>, scalar_prefetch = 0 : i64, scratch_operands = 0 : i64, tpu.core_type = #tpu.core_type<tc>, window_params = [{transform_indices = @transform_0, window_bounds = array<i64: 1, 128, 4>}, {transform_indices = @transform_1, window_bounds = array<i64: 1, 128, 4>}, {transform_indices = @transform_2, window_bounds = array<i64: 1, 8, 4>}, {transform_indices = @transform_3, window_bounds = array<i64: 1, 8, 4>}, {pipeline_mode = #tpu.pipeline_mode<synchronous>, transform_indices = @transform_4, window_bounds = array<i64: 4, 4>}, {pipeline_mode = #tpu.pipeline_mode<synchronous>, transform_indices = @transform_5, window_bounds = array<i64: 1, 4>}, {transform_indices = @transform_6, window_bounds = array<i64: 1, 128, 4>}]} {
    %c0 = arith.constant 0 : index
    %c0_0 = arith.constant 0 : index
    %c0_1 = arith.constant 0 : index
    %0 = vector.load %arg3[%c0, %c0_0, %c0_1] : memref<1x128x4xbf16, #tpu.memory_space<vmem>>, vector<1x128x4xbf16>
    %1 = vector.shape_cast %0 : vector<1x128x4xbf16> to vector<128x4xbf16>
    %c0_2 = arith.constant 0 : index
    %c0_3 = arith.constant 0 : index
    %c0_4 = arith.constant 0 : index
    %2 = vector.load %arg4[%c0_2, %c0_3, %c0_4] : memref<1x8x4xf32, #tpu.memory_space<vmem>>, vector<1x8x4xf32>
    %3 = vector.shape_cast %2 : vector<1x8x4xf32> to vector<8x4xf32>
    %4 = arith.truncf %3 : vector<8x4xf32> to vector<8x4xbf16>
    %c0_5 = arith.constant 0 : index
    %c0_6 = arith.constant 0 : index
    %c0_7 = arith.constant 0 : index
    %5 = vector.load %arg5[%c0_5, %c0_6, %c0_7] : memref<1x8x4xf32, #tpu.memory_space<vmem>>, vector<1x8x4xf32>
    %6 = vector.shape_cast %5 : vector<1x8x4xf32> to vector<8x4xf32>
    %7 = arith.truncf %6 : vector<8x4xf32> to vector<8x4xbf16>
    %cst = arith.constant dense<0.000000e+00> : vector<128x8xf32>
    %8 = tpu.matmul %1, %4, %cst {dimension_numbers = #tpu.dot_dimension_numbers<[1], [1], [0], [0], [0, 0, 1, 0], [], []>} : vector<128x4xbf16>, vector<8x4xbf16>, vector<128x8xf32> -> vector<128x8xf32>
    %cst_8 = arith.constant dense<0xFF800000> : vector<128xf32>
    %9 = vector.multi_reduction <maximumf>, %8, %cst_8 [1] : vector<128x8xf32> to vector<128xf32>
    %10 = vector.shape_cast %9 : vector<128xf32> to vector<128x1xf32>
    %11 = vector.broadcast %10 : vector<128x1xf32> to vector<128x8xf32>
    %12 = arith.subf %8, %11 : vector<128x8xf32>
    %13 = math.exp %12 : vector<128x8xf32>
    %cst_9 = arith.constant dense<0.000000e+00> : vector<128xf32>
    %14 = vector.multi_reduction <add>, %13, %cst_9 [1] : vector<128x8xf32> to vector<128xf32>
    %15 = vector.shape_cast %14 : vector<128xf32> to vector<128x1xf32>
    %16 = tpu.reciprocal %15 {approx = true} : vector<128x1xf32> -> vector<128x1xf32>
    %17 = vector.broadcast %16 : vector<128x1xf32> to vector<128x8xf32>
    %18 = arith.mulf %13, %17 : vector<128x8xf32>
    %19 = arith.truncf %18 : vector<128x8xf32> to vector<128x8xbf16>
    %cst_10 = arith.constant dense<0.000000e+00> : vector<128x4xf32>
    %20 = tpu.matmul %19, %7, %cst_10 {dimension_numbers = #tpu.dot_dimension_numbers<[1], [0], [0], [1], [0, 0, 1, 1], [], []>} : vector<128x8xbf16>, vector<8x4xbf16>, vector<128x4xf32> -> vector<128x4xf32>
    %cst_11 = arith.constant 0.000000e+00 : f32
    %21 = vector.broadcast %cst_11 : f32 to vector<128x4xf32>
    %22 = arith.maximumf %20, %21 : vector<128x4xf32>
    %23 = arith.truncf %22 : vector<128x4xf32> to vector<128x4xbf16>
    %c0_12 = arith.constant 0 : index
    %c0_13 = arith.constant 0 : index
    %24 = vector.load %arg6[%c0_12, %c0_13] : memref<4x4xbf16, #tpu.memory_space<vmem>>, vector<4x4xbf16>
    %cst_14 = arith.constant dense<0.000000e+00> : vector<128x4xf32>
    %25 = tpu.matmul %23, %24, %cst_14 {dimension_numbers = #tpu.dot_dimension_numbers<[1], [0], [0], [1], [0, 0, 1, 1], [], []>} : vector<128x4xbf16>, vector<4x4xbf16>, vector<128x4xf32> -> vector<128x4xf32>
    %c0_15 = arith.constant 0 : index
    %c0_16 = arith.constant 0 : index
    %26 = vector.load %arg7[%c0_15, %c0_16] : memref<1x4xf32, #tpu.memory_space<vmem>>, vector<1x4xf32>
    %27 = vector.broadcast %26 : vector<1x4xf32> to vector<128x4xf32>
    %28 = arith.addf %25, %27 : vector<128x4xf32>
    %c0_17 = arith.constant 0 : index
    %c0_18 = arith.constant 0 : index
    %c0_19 = arith.constant 0 : index
    %29 = vector.load %arg2[%c0_17, %c0_18, %c0_19] : memref<1x128x4xf32, #tpu.memory_space<vmem>>, vector<1x128x4xf32>
    %30 = vector.shape_cast %29 : vector<1x128x4xf32> to vector<128x4xf32>
    %31 = arith.addf %28, %30 : vector<128x4xf32>
    %cst_20 = arith.constant 0.000000e+00 : f32
    %32 = vector.broadcast %cst_20 : f32 to vector<128x4xf32>
    %33 = arith.maximumf %31, %32 : vector<128x4xf32>
    %c0_21 = arith.constant 0 : index
    %c0_22 = arith.constant 0 : index
    %c0_23 = arith.constant 0 : index
    %34 = vector.load %arg8[%c0_21, %c0_22, %c0_23] : memref<1x128x4xf32, #tpu.memory_space<vmem>>, vector<1x128x4xf32>
    %35 = vector.shape_cast %34 : vector<1x128x4xf32> to vector<128x4xf32>
    %36 = vector.shape_cast %33 : vector<128x4xf32> to vector<1x128x4xf32>
    tpu.vector_store %arg8[%c0_21, %c0_22, %c0_23], %36 {strides = array<i32>} : memref<1x128x4xf32, #tpu.memory_space<vmem>>, vector<1x128x4xf32>,
    return
  }
  func.func @transform_0(%arg0: i32, %arg1: i32) -> (i32, i32, i32) {
    %c0_i32 = arith.constant 0 : i32
    %c0_i32_0 = arith.constant 0 : i32
    return %arg0, %arg1, %c0_i32 : i32, i32, i32
  }
  func.func @transform_1(%arg0: i32, %arg1: i32) -> (i32, i32, i32) {
    %c0_i32 = arith.constant 0 : i32
    %c0_i32_0 = arith.constant 0 : i32
    return %arg0, %arg1, %c0_i32 : i32, i32, i32
  }
  func.func @transform_2(%arg0: i32, %arg1: i32) -> (i32, i32, i32) {
    %c0_i32 = arith.constant 0 : i32
    %c0_i32_0 = arith.constant 0 : i32
    %c0_i32_1 = arith.constant 0 : i32
    return %arg0, %c0_i32, %c0_i32_0 : i32, i32, i32
  }
  func.func @transform_3(%arg0: i32, %arg1: i32) -> (i32, i32, i32) {
    %c0_i32 = arith.constant 0 : i32
    %c0_i32_0 = arith.constant 0 : i32
    %c0_i32_1 = arith.constant 0 : i32
    return %arg0, %c0_i32, %c0_i32_0 : i32, i32, i32
  }
  func.func @transform_4(%arg0: i32, %arg1: i32) -> (i32, i32) {
    %c0_i32 = arith.constant 0 : i32
    %c0_i32_0 = arith.constant 0 : i32
    %c0_i32_1 = arith.constant 0 : i32
    return %c0_i32, %c0_i32_0 : i32, i32
  }
  func.func @transform_5(%arg0: i32, %arg1: i32) -> (i32, i32) {
    %c0_i32 = arith.constant 0 : i32
    %c0_i32_0 = arith.constant 0 : i32
    %c0_i32_1 = arith.constant 0 : i32
    return %c0_i32, %c0_i32_0 : i32, i32
  }
  func.func @transform_6(%arg0: i32, %arg1: i32) -> (i32, i32, i32) {
    %c0_i32 = arith.constant 0 : i32
    %c0_i32_0 = arith.constant 0 : i32
    return %arg0, %arg1, %c0_i32 : i32, i32, i32
  }
}

</mosaic_0001>

<bundles_post_ra>
// kernel: emau_forward.5
= control target key start
LH: loop header
LB: loop body
LE: loop exit
PB: predicated region body
PF: predicated region fallthrough
CT: control target
= control target key end

     0   :  { %s725_s12 = smov 0   ;;  %s727_s13 = smov 0   ;;  %s828_s0 = inlined_call_operand.vmem [shape: f32[2,256,4], index: 0, kind: input, shape index: {}]   ;;  %s829_s1 = inlined_call_operand.vmem [shape: bf16[4,4], index: 1, kind: input, shape index: {}]   ;;  %s830_s2 = inlined_call_operand.vmem [shape: f32[1,4], index: 2, kind: input, shape index: {}]   ;;  %s831_s3 = inlined_call_operand.vmem [shape: bf16[2,256,4], index: 3, kind: output, shape index: {}]  }
   0x1   :  { %s729_s14 = smov 0   ;;  %s731_s15 = smov 0  }
   0x2   :  { %s733_s16 = smov 0  }
   0x3 LB: > { %s22_s17 = sadd.s32 1, %s695_s14  ;;  %s25_s18 = sadd.s32 1, %s699_s15  ;;  %s703_s16 = sphi %s733_s16, %s13_s16   ;;  %s699_s15 = sphi %s731_s15, %s835_s15   ;;  %s695_s14 = sphi %s729_s14, %s834_s14   ;;  %s691_s13 = sphi %s727_s13, %s833_s13   ;;  %s687_s12 = sphi %s725_s12, %s832_s12  }
   0x4   : > { %p23_p0 = scmp.ge.s32.totalorder %s22_s17, 2  ;;  %p544_p1 = scmp.ge.s32.totalorder %s703_s16, 1 }
   0x5   : > { %p158_p2 = scmp.lt.s32.totalorder %s703_s16, 5 }
   0x6   : > { %s837_s17 = smov (%p23_p0, %s22_s17), 0  ;;  %s839_s18 = smov (!%p23_p0, %s25_s18), %s699_s15 }
   0x7   : > { %p159_p3 = pnand %p544_p1, %p158_p2  ;;  %p27_p4 = scmp.ge.s32.totalorder %s839_s18, 2 }
   0x8   : > { %s545_s21 = sshll.u32 (!%p159_p3), %s687_s12, 4  ;;  %p191_p5 = scmp.lt.s32.totalorder (!%p159_p3), %s691_s13, 1 }
   0x9   : > { %s841_s18 = smov (%p27_p4, %s839_s18), 0  ;;  %162 = sbr.rel (%p159_p3) target bundleno = 236 (0xec), region = 32 }
   0xa   : > { %p193_p6 = scmp.lt.s32.totalorder (!%p159_p3), %s545_s21, 31 }
   0xe   : > { %v235_v0 = vld [vmem:[%s829_s1] sm:$0x3]  ;;  %vm268_vm0 = vcmask 1041408   ;;  %s843_s13 = smov (!%p191_p5, %s691_s13), 1  ;;  %s845_s21 = smov (!%p193_p6, %s545_s21), 31  ;;  %vm243_vm1 = vcmask 31744  }
   0xf   : > { %623 = vmatprep.subr.msk.bf16.mxu0 %vm268_vm0, %v235_v0  ;;  %624 = vmatprep.subr.msk.bf16.mxu1 %vm268_vm0, %v235_v0  ;;  %v270_v1 = vsel %vm268_vm0, %v235_v0, 0  ;;  %s546_s22 = sshll.u32 %s843_s13, 5  ;;  %v551_v26 = vld [vmem:[%s830_s2] ss:$0 sm:$0xff]  ;;  %vm433_vm2 = vcmask 27648  }
  0x10   : > { %604 = vmatpush3.bf16.msra.mxu0 %v270_v1  ;;  %622 = vmatpush3.bf16.msra.mxu1 %v270_v1  ;;  %s758_s23 = sadd.s32 %s546_s22, %s845_s21 }
  0x11   : > { %s547_s24 = sshll.u32 %s758_s23, 3  ;;  %s550_s30 = sshll.u32 %s758_s23, 2 }
  0x12   : > { %s198_s27 = scalar_lea.vmem %s828_s0, %s547_s24  ;;  %s779_s6 = scalar_lea.vmem %s831_s3, %s550_s30 }
  0x13   : > { %v211_v2 = vld [vmem:[%s198_s27] sm:$0xff]  ;;  %v212_v3 = vld [vmem:[%s198_s27 + $0x8] sm:$0xff]  ;;  %v213_v7 = vld [vmem:[%s198_s27 + $0x10] sm:$0xff] }
  0x14   : > { %v219_v4 = vld [vmem:[%s198_s27 + $0x40] sm:$0xff]  ;;  %v227_v5 = vpack.c.bf16 %v212_v3, %v211_v2  ;;  %v220_v6 = vld [vmem:[%s198_s27 + $0x48] sm:$0xff]  ;;  %v214_v8 = vld [vmem:[%s198_s27 + $0x18] sm:$0xff] }
  0x15   : > { %v231_v9 = vpack.c.bf16 %v220_v6, %v219_v4  ;;  %v228_v10 = vpack.c.bf16 %v214_v8, %v213_v7  ;;  %v221_v11 = vld [vmem:[%s198_s27 + $0x50] sm:$0xff]  ;;  %v222_v12 = vld [vmem:[%s198_s27 + $0x58] sm:$0xff]  ;;  %v215_v13 = vld [vmem:[%s198_s27 + $0x20] sm:$0xff] }
  0x16   : > { %605 = vmatprep.mubr.msk.bf16.mxu0 %vm243_vm1, %v227_v5  ;;  %v232_v14 = vpack.c.bf16 %v222_v12, %v221_v11  ;;  %v216_v15 = vld [vmem:[%s198_s27 + $0x28] sm:$0xff]  ;;  %v223_v16 = vld [vmem:[%s198_s27 + $0x60] sm:$0xff]  ;;  %v217_v20 = vld [vmem:[%s198_s27 + $0x30] sm:$0xff] }
  0x17   : > { %v224_v17 = vld [vmem:[%s198_s27 + $0x68] sm:$0xff]  ;;  %613 = vmatprep.mubr.msk.bf16.mxu1 %vm243_vm1, %v231_v9  ;;  %606 = vmatmul.mubr.msk.bf16.vlgmr.msra.gmra.mxu0 %vm243_vm1, %v228_v10  ;;  %v229_v18 = vpack.c.bf16 %v216_v15, %v215_v13  ;;  %v218_v21 = vld [vmem:[%s198_s27 + $0x38] sm:$0xff]  ;;  %v225_v22 = vld [vmem:[%s198_s27 + $0x70] sm:$0xff] }
  0x18   : > { %v233_v19 = vpack.c.bf16 %v224_v17, %v223_v16  ;;  %614 = vmatmul.mubr.msk.bf16.vlgmr.msra.gmra.mxu1 %vm243_vm1, %v232_v14  ;;  %v226_v23 = vld [vmem:[%s198_s27 + $0x78] sm:$0xff]  ;;  %v230_v24 = vpack.c.bf16 %v218_v21, %v217_v20 }
  0x19   : > { %609 = vmatprep.mubr.msk.bf16.mxu0 %vm243_vm1, %v229_v18  ;;  %v234_v25 = vpack.c.bf16 %v226_v23, %v225_v22 }
  0x1a   : > { %617 = vmatprep.mubr.msk.bf16.mxu1 %vm243_vm1, %v233_v19 }
  0x1f   : > { %610 = vmatmul.mubr.msk.bf16.gmra.mxu0 %vm243_vm1, %v230_v24 }
  0x20   : > { %618 = vmatmul.mubr.msk.bf16.gmra.mxu1 %vm243_vm1, %v234_v25 }
  0xd7   : > { %v607_v27 = vpop.f32.mrf.mxu0 }
  0xd8   : > { %v315_v28 = vadd.f32 %v607_v27, %v551_v26  ;;  %v615_v29 = vpop.f32.mrf.mxu1 }
  0xd9   : > { %v347_v30 = vadd.f32 %v615_v29, %v551_v26  ;;  %v306_v31 = vpop.f32.mrf.mxu0 }
  0xda   : > { %v580_v32 = vpack.c.bf16 %v315_v28, %v315_v28  ;;  %v307_v33 = vadd.f32 %v551_v26, %v306_v31  ;;  %v338_v34 = vpop.f32.mrf.mxu1 }
  0xdb   : > { %v588_v35 = vpack.c.bf16 %v347_v30, %v347_v30  ;;  %v339_v36 = vadd.f32 %v551_v26, %v338_v34  ;;  %v608_v37 = vpop.f32.mrf.mxu0 }
  0xdc   : > { %436 = vst.msk [vmem:[%s779_s6 + $0x8] sm:$0xf] %vm433_vm2, %v580_v32  ;;  %v578_v38 = vpack.c.bf16 %v307_v33, %v307_v33  ;;  %v318_v39 = vadd.f32 %v608_v37, %v551_v26  ;;  %v616_v40 = vpop.f32.mrf.mxu1 }
  0xdd   : > { %444 = vst.msk [vmem:[%s779_s6 + $0x28] sm:$0xf] %vm433_vm2, %v588_v35  ;;  %v586_v41 = vpack.c.bf16 %v339_v36, %v339_v36  ;;  %v350_v42 = vadd.f32 %v616_v40, %v551_v26  ;;  %v309_v43 = vpop.f32.mrf.mxu0 }
  0xde   : > { %434 = vst.msk [vmem:[%s779_s6] sm:$0xf] %vm433_vm2, %v578_v38  ;;  %v581_v44 = vpack.c.bf16 %v318_v39, %v318_v39  ;;  %v310_v45 = vadd.f32 %v551_v26, %v309_v43  ;;  %v341_v46 = vpop.f32.mrf.mxu1 }
  0xdf   : > { %442 = vst.msk [vmem:[%s779_s6 + $0x20] sm:$0xf] %vm433_vm2, %v586_v41  ;;  %v589_v47 = vpack.c.bf16 %v350_v42, %v350_v42  ;;  %v342_v48 = vadd.f32 %v551_v26, %v341_v46  ;;  %v611_v49 = vpop.f32.mrf.mxu0 }
  0xe0   : > { %437 = vst.msk [vmem:[%s779_s6 + $0xc] sm:$0xf] %vm433_vm2, %v581_v44  ;;  %v579_v50 = vpack.c.bf16 %v310_v45, %v310_v45  ;;  %v331_v51 = vadd.f32 %v611_v49, %v551_v26  ;;  %v619_v52 = vpop.f32.mrf.mxu1 }
  0xe1   : > { %445 = vst.msk [vmem:[%s779_s6 + $0x2c] sm:$0xf] %vm433_vm2, %v589_v47  ;;  %v587_v53 = vpack.c.bf16 %v342_v48, %v342_v48  ;;  %v363_v54 = vadd.f32 %v619_v52, %v551_v26  ;;  %v322_v55 = vpop.f32.mrf.mxu0 }
  0xe2   : > { %435 = vst.msk [vmem:[%s779_s6 + $0x4] sm:$0xf] %vm433_vm2, %v579_v50  ;;  %v584_v56 = vpack.c.bf16 %v331_v51, %v331_v51  ;;  %v323_v57 = vadd.f32 %v551_v26, %v322_v55  ;;  %v354_v58 = vpop.f32.mrf.mxu1 }
  0xe3   : > { %443 = vst.msk [vmem:[%s779_s6 + $0x24] sm:$0xf] %vm433_vm2, %v587_v53  ;;  %v592_v59 = vpack.c.bf16 %v363_v54, %v363_v54  ;;  %v355_v60 = vadd.f32 %v551_v26, %v354_v58  ;;  %v612_v61 = vpop.f32.mrf.mxu0 }
  0xe4   : > { %440 = vst.msk [vmem:[%s779_s6 + $0x18] sm:$0xf] %vm433_vm2, %v584_v56  ;;  %v582_v62 = vpack.c.bf16 %v323_v57, %v323_v57  ;;  %v334_v63 = vadd.f32 %v612_v61, %v551_v26  ;;  %v620_v0 = vpop.f32.mrf.mxu1 }
  0xe5   : > { %448 = vst.msk [vmem:[%s779_s6 + $0x38] sm:$0xf] %vm433_vm2, %v592_v59  ;;  %v590_v1 = vpack.c.bf16 %v355_v60, %v355_v60  ;;  %v366_v2 = vadd.f32 %v620_v0, %v551_v26  ;;  %v325_v3 = vpop.f32.mrf.mxu0 }
  0xe6   : > { %438 = vst.msk [vmem:[%s779_s6 + $0x10] sm:$0xf] %vm433_vm2, %v582_v62  ;;  %v585_v4 = vpack.c.bf16 %v334_v63, %v334_v63  ;;  %v326_v5 = vadd.f32 %v551_v26, %v325_v3  ;;  %v357_v6 = vpop.f32.mrf.mxu1 }
  0xe7   : > { %446 = vst.msk [vmem:[%s779_s6 + $0x30] sm:$0xf] %vm433_vm2, %v590_v1  ;;  %v593_v7 = vpack.c.bf16 %v366_v2, %v366_v2  ;;  %v358_v8 = vadd.f32 %v551_v26, %v357_v6 }
  0xe8   : > { %441 = vst.msk [vmem:[%s779_s6 + $0x1c] sm:$0xf] %vm433_vm2, %v585_v4  ;;  %v583_v9 = vpack.c.bf16 %v326_v5, %v326_v5 }
  0xe9   : > { %449 = vst.msk [vmem:[%s779_s6 + $0x3c] sm:$0xf] %vm433_vm2, %v593_v7  ;;  %v591_v10 = vpack.c.bf16 %v358_v8, %v358_v8 }
  0xea   : > { %439 = vst.msk [vmem:[%s779_s6 + $0x14] sm:$0xf] %vm433_vm2, %v583_v9 }
  0xeb   : > { %447 = vst.msk [vmem:[%s779_s6 + $0x34] sm:$0xf] %vm433_vm2, %v591_v10 }
  0xec PF: > { %s13_s16 = sadd.s32 1, %s703_s16   ;;  %s832_s12 = smov %s695_s14 }
  0xed   : > { %p10_p7 = scmp.ge.s32.totalorder %s13_s16, 6   ;;  %s833_s13 = smov %s699_s15 }
  0xee   : > { %s834_s14 = smov %s837_s17  ;;  %s835_s15 = smov %s841_s18 }
  0xef   :  { %12 = sbr.rel (!%p10_p7) target bundleno = 3 (0x3), region = 62 }

// kernel: emau_forward.6
= control target key start
LH: loop header
LB: loop body
LE: loop exit
PB: predicated region body
PF: predicated region fallthrough
CT: control target
= control target key end

     0   :  { %s1171_s9 = smov 0   ;;  %s1173_s10 = smov 0   ;;  %s1406_s0 = inlined_call_operand.vmem [shape: bf16[2,256,4], index: 0, kind: input, shape index: {}]   ;;  %s1407_s1 = inlined_call_operand.vmem [shape: f32[2,8,4], index: 1, kind: input, shape index: {}]   ;;  %s1408_s2 = inlined_call_operand.vmem [shape: f32[2,8,4], index: 2, kind: output, shape index: {}]  }
   0x1   :  { %s1175_s11 = smov 0   ;;  %s1177_s12 = smov 0  }
   0x2   :  { %s1179_s13 = smov 0  }
   0x3 LB: > { %s21_s14 = sadd.s32 1, %s1141_s11  ;;  %s24_s15 = sadd.s32 1, %s1145_s12  ;;  %s1149_s13 = sphi %s1179_s13, %s12_s13   ;;  %s1145_s12 = sphi %s1177_s12, %s1412_s12   ;;  %s1141_s11 = sphi %s1175_s11, %s1411_s11   ;;  %s1137_s10 = sphi %s1173_s10, %s1410_s10   ;;  %s1133_s9 = sphi %s1171_s9, %s1409_s9  }
   0x4   : > { %p22_p0 = scmp.ge.s32.totalorder %s21_s14, 2  ;;  %p852_p1 = scmp.ge.s32.totalorder %s1149_s13, 1 }
   0x5   : > { %p140_p2 = scmp.lt.s32.totalorder %s1149_s13, 5 }
   0x6   : > { %s1414_s14 = smov (%p22_p0, %s21_s14), 0  ;;  %s1416_s15 = smov (!%p22_p0, %s24_s15), %s1145_s12 }
   0x7   : > { %p141_p3 = pnand %p852_p1, %p140_p2  ;;  %p26_p4 = scmp.ge.s32.totalorder %s1416_s15, 2 }
   0x8   : > { %s853_s16 = sshll.u32 (!%p141_p3), %s1133_s9, 4  ;;  %p170_p5 = scmp.lt.s32.totalorder (!%p141_p3), %s1137_s10, 1 }
   0x9   : > { %s1418_s15 = smov (%p26_p4, %s1416_s15), 0  ;;  %144 = sbr.rel (%p141_p3) target bundleno = 1194 (0x4aa), region = 28 }
   0xa   : > { %p172_p6 = scmp.lt.s32.totalorder (!%p141_p3), %s853_s16, 31  ;;  %p858_p7 = scmp.ne.s32.totalorder (!%p141_p3), %s1133_s9, 0 }
   0xe   : > { %s1420_s10 = smov (!%p170_p5, %s1137_s10), 1  ;;  %s1422_s16 = smov (!%p172_p6, %s853_s16), 31 }
   0xf   : > { %s854_s17 = sshll.u32 %s1420_s10, 5  ;;  %s856_s18 = sshll.u32 %s1420_s10, 3 }
  0x10   : > { %s175_s19 = sadd.s32 %s854_s17, %s1422_s16  ;;  %s182_s22 = scalar_lea.vmem %s1407_s1, %s856_s18 }
  0x11   : > { %s855_s23 = sshll.u32 %s175_s19, 2  ;;  %s1210_s26 = scalar_lea.vmem %s1408_s2, %s856_s18 }
  0x12   : > { %s177_s29 = scalar_lea.vmem %s1406_s0, %s855_s23  ;;  %191 = sbr.rel (%p858_p7) target bundleno = 26 (0x1a), region = 32 }
  0x17   : > { %vm192_vm0 = vcmask 31744   ;;  %vm194_vm1 = vcmask 7168   ;;  %v1151_v0 = vmov 0.0  }
  0x18   : > { %193 = vst.msk [vmem:[#allocation2] sm:$0xff] %vm192_vm0, %v1151_v0 }
  0x19   : > { %195 = vst.msk [vmem:[#allocation3] sm:$0xff] %vm194_vm1, %v1151_v0 }
  0x1a PF: > { %v212_v1 = vld [vmem:[%s182_s22] sm:$0xff]  ;;  %vm254_vm2 = vcmask 31744   ;;  %v1222_v5 = vld [vmem:[%s177_s29 + $0x8] sm:$0xff]   ;;  %v1224_v6 = vld [vmem:[%s177_s29 + $0x10] sm:$0xff]   ;;  %vm379_vm3 = vcmask 64512   ;;  %vm1154_vm4 = vmmov 0  }
  0x1b   : > { %v213_v2 = vpack.c.bf16 %v212_v1, %v212_v1  ;;  %v1216_v3 = vld [vmem:[%s177_s29] sm:$0xff]   ;;  %v1230_v7 = vld [vmem:[%s177_s29 + $0x18] sm:$0xff]   ;;  %v1238_v9 = vld [vmem:[%s177_s29 + $0x28] sm:$0xff]   ;;  %vm660_vm5 = vcmask 7168   ;;  %p875_p8 = scmp.ne.s32.totalorder %s1133_s9, 1 }
  0x1c   : > { %915 = vmatprep.mubr.msk.bf16.mxu1 %vm254_vm2, %v1216_v3  ;;  %v1232_v8 = vld [vmem:[%s177_s29 + $0x20] sm:$0xff]   ;;  %v1240_v10 = vld [vmem:[%s177_s29 + $0x30] sm:$0xff]   ;;  %v1246_v11 = vld [vmem:[%s177_s29 + $0x38] sm:$0xff]  }
  0x1d   : > { %986 = vmatprep.subr.msk.bf16.mxu1 %vm254_vm2, %v213_v2  ;;  %v280_v4 = vsel %vm254_vm2, %v213_v2, 0 }
  0x1e   : > { %914 = vmatpush3.bf16.xpose.msra.mxu1 %v280_v4 }
  0x25   : > { %916 = vmatmul.mubr.msk.bf16.vlgmr.msra.gmra.mxu1 %vm254_vm2, %v1222_v5 }
  0x26   : > { %919 = vmatprep.mubr.msk.bf16.mxu1 %vm254_vm2, %v1224_v6 }
  0x2d   : > { %920 = vmatmul.mubr.msk.bf16.gmra.mxu1 %vm254_vm2, %v1230_v7 }
  0x2e   : > { %923 = vmatprep.mubr.msk.bf16.mxu1 %vm254_vm2, %v1232_v8 }
  0x35   : > { %924 = vmatmul.mubr.msk.bf16.gmra.mxu1 %vm254_vm2, %v1238_v9 }
  0x36   : > { %927 = vmatprep.mubr.msk.bf16.mxu1 %vm254_vm2, %v1240_v10 }
  0x3d   : > { %928 = vmatmul.mubr.msk.bf16.gmra.mxu1 %vm254_vm2, %v1246_v11 }
  0xe5   : > { %v917_v12 = vpop.f32.mrf.mxu1 }
  0xe6   : > { %v386_v13 = vsel %vm379_vm3, %v917_v12, -inf }
  0xe7   : > { %387 = vmax.xlane.f32.xlu1 %v386_v13  ;;  %v316_v14 = vpop.f32.mrf.mxu1 }
  0xe8   : > { %v380_v15 = vsel %vm379_vm3, %v316_v14, -inf }
  0xe9   : > { %381 = vmax.xlane.f32.xlu0 %v380_v15  ;;  %v918_v16 = vpop.f32.mrf.mxu1 }
  0xea   : > { %v389_v17 = vsel %vm379_vm3, %v918_v16, -inf }
  0xeb   : > { %390 = vmax.xlane.f32.xlu1 %v389_v17  ;;  %v319_v18 = vpop.f32.mrf.mxu1 }
  0xec   : > { %v383_v19 = vsel %vm379_vm3, %v319_v18, -inf }
  0xed   : > { %384 = vmax.xlane.f32.xlu0 %v383_v19  ;;  %v921_v20 = vpop.f32.mrf.mxu1 }
  0xee   : > { %v398_v21 = vsel %vm379_vm3, %v921_v20, -inf }
  0xef   : > { %v332_v22 = vpop.f32.mrf.mxu1 }
  0xf0   : > { %v392_v25 = vsel %vm379_vm3, %v332_v22, -inf }
  0xf1   : > { %399 = vmax.xlane.f32.xlu0 %v398_v21  ;;  %v922_v23 = vpop.f32.mrf.mxu1 }
  0xf2   : > { %v401_v24 = vsel %vm379_vm3, %v922_v23, -inf }
  0xf3   : > { %402 = vmax.xlane.f32.xlu1 %v401_v24  ;;  %v335_v26 = vpop.f32.mrf.mxu1 }
  0xf4   : > { %v395_v27 = vsel %vm379_vm3, %v335_v26, -inf }
  0xf5   : > { %393 = vmax.xlane.f32.xlu0 %v392_v25  ;;  %v1258_v28 = vpop.f32.mrf.mxu1 }
  0xf6   : > { %v410_v29 = vsel %vm379_vm3, %v1258_v28, -inf }
  0xf7   : > { %396 = vmax.xlane.f32.xlu1 %v395_v27  ;;  %v1262_v30 = vpop.f32.mrf.mxu1 }
  0xf8   : > { %v404_v33 = vsel %vm379_vm3, %v1262_v30, -inf }
  0xf9   : > { %411 = vmax.xlane.f32.xlu0 %v410_v29  ;;  %v1264_v31 = vpop.f32.mrf.mxu1 }
  0xfa   : > { %v413_v32 = vsel %vm379_vm3, %v1264_v31, -inf }
  0xfb   : > { %414 = vmax.xlane.f32.xlu1 %v413_v32  ;;  %v1270_v34 = vpop.f32.mrf.mxu1 }
  0xfc   : > { %v407_v35 = vsel %vm379_vm3, %v1270_v34, -inf }
  0xfd   : > { %405 = vmax.xlane.f32.xlu0 %v404_v33  ;;  %v1274_v36 = vpop.f32.mrf.mxu1 }
  0xfe   : > { %v422_v40 = vsel %vm379_vm3, %v1274_v36, -inf }
  0xff   : > { %408 = vmax.xlane.f32.xlu1 %v407_v35  ;;  %v1276_v37 = vpop.f32.mrf.mxu1 }
 0x100   : > { %v416_v38 = vsel %vm379_vm3, %v1276_v37, -inf }
 0x101   : > { %417 = vmax.xlane.f32.xlu0 %v416_v38  ;;  %v1280_v39 = vpop.f32.mrf.mxu1 }
 0x102   : > { %v425_v43 = vsel %vm379_vm3, %v1280_v39, -inf }
 0x103   : > { %v1284_v41 = vpop.f32.mrf.mxu1 }
 0x104   : > { %v419_v42 = vsel %vm379_vm3, %v1284_v41, -inf }
 0x105   : > { %423 = vmax.xlane.f32.xlu0 %v422_v40  ;;  %420 = vmax.xlane.f32.xlu1 %v419_v42 }
 0x109   : > { %426 = vmax.xlane.f32.xlu1 %v425_v43 }
 0x170   : > { %v388_v44 = vpop.xlane.xlu1 %387 }
 0x171   : > { %v430_v45 = vsub.f32 %v917_v12, %v388_v44 }
 0x172   : > { %v382_v46 = vpop.xlane.xlu0 %381 }
 0x173   : > { %v448_v47 = vmul.f32 1.442695, %v430_v45  ;;  %v428_v48 = vsub.f32 %v316_v14, %v382_v46 }
 0x174   : > { %v391_v49 = vpop.xlane.xlu1 %390 }
 0x175   : > { %1040 = vpow2.f32 %v448_v47  ;;  %v444_v50 = vmul.f32 1.442695, %v428_v48  ;;  %v431_v51 = vsub.f32 %v918_v16, %v391_v49 }
 0x176   : > { %v385_v52 = vpop.xlane.xlu0 %384 }
 0x177   : > { %1042 = vpow2.f32 %v444_v50  ;;  %v450_v53 = vmul.f32 1.442695, %v431_v51  ;;  %v429_v54 = vsub.f32 %v319_v18, %v385_v52 }
 0x179   : > { %1044 = vpow2.f32 %v450_v53  ;;  %v446_v55 = vmul.f32 1.442695, %v429_v54 }
 0x17a   : > { %v400_v56 = vpop.xlane.xlu0 %399 }
 0x17b   : > { %1046 = vpow2.f32 %v446_v55  ;;  %v434_v57 = vsub.f32 %v921_v20, %v400_v56 }
 0x17c   : > { %v403_v58 = vpop.xlane.xlu1 %402 }
 0x17d   : > { %v456_v59 = vmul.f32 1.442695, %v434_v57  ;;  %v435_v60 = vsub.f32 %v922_v23, %v403_v58 }
 0x17e   : > { %v394_v61 = vpop.xlane.xlu0 %393 }
 0x17f   : > { %1048 = vpow2.f32 %v456_v59  ;;  %v458_v62 = vmul.f32 1.442695, %v435_v60  ;;  %v432_v63 = vsub.f32 %v332_v22, %v394_v61 }
 0x180   : > { %v397_v0 = vpop.xlane.xlu1 %396 }
 0x181   : > { %1050 = vpow2.f32 %v458_v62  ;;  %v452_v1 = vmul.f32 1.442695, %v432_v63  ;;  %v433_v2 = vsub.f32 %v335_v26, %v397_v0 }
 0x182   : > { %v1290_v4 = vpop.eup %1040  ;;  %v412_v12 = vpop.xlane.xlu0 %411 }
 0x183   : > { %1052 = vpow2.f32 %v452_v1  ;;  %v454_v13 = vmul.f32 1.442695, %v433_v2  ;;  %v438_v14 = vsub.f32 %v1258_v28, %v412_v12  ;;  %v482_v15 = vsel %vm379_vm3, %v1290_v4, 0.0 }
 0x184   : > { %v1295_v16 = vpop.eup %1042  ;;  %v415_v17 = vpop.xlane.xlu1 %414  ;;  %483 = vadd.xlane.f32.xlu0 %v482_v15 }
 0x185   : > { %1054 = vpow2.f32 %v454_v13  ;;  %v464_v18 = vmul.f32 1.442695, %v438_v14  ;;  %v439_v19 = vsub.f32 %v1264_v31, %v415_v17  ;;  %v476_v22 = vsel %vm379_vm3, %v1295_v16, 0.0 }
 0x186   : > { %v1298_v20 = vpop.eup %1044  ;;  %v406_v21 = vpop.xlane.xlu0 %405  ;;  %v1152_v13 = vmov 0.0   ;;  %v1153_v14 = vmov 1.0  }
 0x187   : > { %1056 = vpow2.f32 %v464_v18  ;;  %v466_v23 = vmul.f32 1.442695, %v439_v19  ;;  %v436_v24 = vsub.f32 %v1262_v30, %v406_v21  ;;  %v485_v25 = vsel %vm379_vm3, %v1298_v20, 0.0  ;;  %966 = vmatprep.subr.bf16.mxu0 %v1152_v13  ;;  %931 = vmatprep.subr.mxu1 %v1152_v13 }
 0x188   : > { %v1305_v26 = vpop.eup %1046  ;;  %v409_v27 = vpop.xlane.xlu1 %408  ;;  %477 = vadd.xlane.f32.xlu0 %v476_v22  ;;  %486 = vadd.xlane.f32.xlu1 %v485_v25 }
 0x189   : > { %1058 = vpow2.f32 %v466_v23  ;;  %v460_v28 = vmul.f32 1.442695, %v436_v24  ;;  %v437_v29 = vsub.f32 %v1270_v34, %v409_v27  ;;  %v479_v30 = vsel %vm379_vm3, %v1305_v26, 0.0  ;;  %967 = vmatpush3.bf16.msra.mxu0 %v1246_v11  ;;  %932 = vmatpush3.msra.mxu1 %v1153_v14 }
 0x18a   : > { %v418_v31 = vpop.xlane.xlu0 %417  ;;  %968 = vmatprep.subr.bf16.mxu0 %v1152_v13  ;;  %933 = vmatprep.subr.mxu1 %v1152_v13 }
 0x18b   : > { %1060 = vpow2.f32 %v460_v28  ;;  %v462_v32 = vmul.f32 1.442695, %v437_v29  ;;  %v440_v33 = vsub.f32 %v1276_v37, %v418_v31  ;;  %934 = vmatpush3.msra.mxu1 %v1153_v14  ;;  %982 = vmatprep.mubr.msk.bf16.mxu0 %vm1154_vm4, %v1152_v13 }
 0x18c   : > { %v1311_v35 = vpop.eup %1048  ;;  %480 = vadd.xlane.f32.xlu1 %v479_v30  ;;  %935 = vmatprep.subr.mxu1 %v1152_v13 }
 0x18d   : > { %1062 = vpow2.f32 %v462_v32  ;;  %v468_v38 = vmul.f32 1.442695, %v440_v33  ;;  %v494_v40 = vsel %vm379_vm3, %v1311_v35, 0.0  ;;  %963 = vmatprep.mubr.msk.f32.mxu1 %vm1154_vm4, %v1152_v13  ;;  %969 = vmatpush3.bf16.msra.mxu0 %v1240_v10 }
 0x18e   : > { %v1315_v42 = vpop.eup %1050  ;;  %495 = vadd.xlane.f32.xlu0 %v494_v40  ;;  %v424_v34 = vpop.xlane.xlu0 %423  ;;  %936 = vmatpush3.msra.mxu1 %v1153_v14 }
 0x18f   : > { %v421_v43 = vpop.xlane.xlu1 %420  ;;  %1064 = vpow2.f32 %v468_v38  ;;  %v442_v44 = vsub.f32 %v1274_v36, %v424_v34  ;;  %v497_v37 = vsel %vm379_vm3, %v1315_v42, 0.0  ;;  %970 = vmatprep.subr.bf16.mxu0 %v1152_v13  ;;  %937 = vmatprep.subr.mxu1 %v1152_v13 }
 0x190   : > { %v1320_v45 = vpop.eup %1052  ;;  %498 = vadd.xlane.f32.xlu1 %v497_v37  ;;  %v441_v47 = vsub.f32 %v1284_v41, %v421_v43  ;;  %938 = vmatpush3.msra.mxu1 %v1153_v14 }
 0x191   : > { %v472_v46 = vmul.f32 1.442695, %v442_v44  ;;  %v488_v48 = vsel %vm379_vm3, %v1320_v45, 0.0  ;;  %939 = vmatprep.subr.mxu1 %v1152_v13  ;;  %971 = vmatpush3.bf16.msra.mxu0 %v1238_v9 }
 0x192   : > { %v1325_v49 = vpop.eup %1054  ;;  %489 = vadd.xlane.f32.xlu0 %v488_v48  ;;  %v470_v53 = vmul.f32 1.442695, %v441_v47  ;;  %940 = vmatpush3.msra.mxu1 %v1153_v14 }
 0x193   : > { %v427_v50 = vpop.xlane.xlu1 %426  ;;  %1066 = vpow2.f32 %v472_v46  ;;  %v491_v36 = vsel %vm379_vm3, %v1325_v49, 0.0  ;;  %972 = vmatprep.subr.bf16.mxu0 %v1152_v13  ;;  %941 = vmatprep.subr.mxu1 %v1152_v13 }
 0x194   : > { %v443_v51 = vsub.f32 %v1280_v39, %v427_v50  ;;  %v1330_v52 = vpop.eup %1056  ;;  %492 = vadd.xlane.f32.xlu1 %v491_v36  ;;  %942 = vmatpush3.msra.mxu1 %v1153_v14 }
 0x195   : > { %v506_v41 = vsel %vm379_vm3, %v1330_v52, 0.0  ;;  %943 = vmatprep.subr.mxu1 %v1152_v13  ;;  %973 = vmatpush3.bf16.msra.mxu0 %v1232_v8 }
 0x196   : > { %v474_v54 = vmul.f32 1.442695, %v443_v51  ;;  %v1334_v55 = vpop.eup %1058  ;;  %507 = vadd.xlane.f32.xlu0 %v506_v41  ;;  %944 = vmatpush3.msra.mxu1 %v1153_v14 }
 0x197   : > { %v509_v56 = vsel %vm379_vm3, %v1334_v55, 0.0  ;;  %974 = vmatprep.subr.bf16.mxu0 %v1152_v13  ;;  %945 = vmatprep.subr.mxu1 %v1152_v13 }
 0x198   : > { %1068 = vpow2.f32 %v474_v54  ;;  %v1338_v57 = vpop.eup %1060  ;;  %510 = vadd.xlane.f32.xlu1 %v509_v56  ;;  %946 = vmatpush3.msra.mxu1 %v1153_v14 }
 0x199   : > { %1070 = vpow2.f32 %v470_v53  ;;  %v500_v39 = vsel %vm379_vm3, %v1338_v57, 0.0  ;;  %947 = vmatprep.subr.mxu1 %v1152_v13  ;;  %975 = vmatpush3.bf16.msra.mxu0 %v1230_v7 }
 0x19a   : > { %v1342_v58 = vpop.eup %1062  ;;  %501 = vadd.xlane.f32.xlu0 %v500_v39  ;;  %948 = vmatpush3.msra.mxu1 %v1153_v14 }
 0x19b   : > { %v503_v59 = vsel %vm379_vm3, %v1342_v58, 0.0  ;;  %976 = vmatprep.subr.bf16.mxu0 %v1152_v13  ;;  %949 = vmatprep.subr.mxu1 %v1152_v13 }
 0x19c   : > { %v1346_v60 = vpop.eup %1064  ;;  %504 = vadd.xlane.f32.xlu1 %v503_v59  ;;  %950 = vmatpush3.msra.mxu1 %v1153_v14 }
 0x19d   : > { %v512_v61 = vsel %vm379_vm3, %v1346_v60, 0.0  ;;  %951 = vmatprep.subr.mxu1 %v1152_v13  ;;  %977 = vmatpush3.bf16.msra.mxu0 %v1224_v6 }
 0x19e   : > { %513 = vadd.xlane.f32.xlu0 %v512_v61  ;;  %952 = vmatpush3.msra.mxu1 %v1153_v14 }
 0x19f   : > { %978 = vmatprep.subr.bf16.mxu0 %v1152_v13  ;;  %953 = vmatprep.subr.mxu1 %v1152_v13 }
 0x1a0   : > { %v1350_v62 = vpop.eup %1066  ;;  %954 = vmatpush3.msra.mxu1 %v1153_v14 }
 0x1a1   : > { %v518_v63 = vsel %vm379_vm3, %v1350_v62, 0.0  ;;  %955 = vmatprep.subr.mxu1 %v1152_v13  ;;  %979 = vmatpush3.bf16.msra.mxu0 %v1222_v5 }
 0x1a2   : > { %519 = vadd.xlane.f32.xlu0 %v518_v63  ;;  %956 = vmatpush3.msra.mxu1 %v1153_v14 }
 0x1a3   : > { %980 = vmatprep.subr.bf16.mxu0 %v1152_v13  ;;  %957 = vmatprep.subr.mxu1 %v1152_v13 }
 0x1a4   : > { %958 = vmatpush3.msra.mxu1 %v1153_v14 }
 0x1a5   : > { %v1354_v0 = vpop.eup %1068  ;;  %959 = vmatprep.subr.mxu1 %v1152_v13  ;;  %981 = vmatpush3.bf16.msra.mxu0 %v1216_v3 }
 0x1a6   : > { %v521_v1 = vsel %vm379_vm3, %v1354_v0, 0.0  ;;  %v1358_v2 = vpop.eup %1070  ;;  %960 = vmatpush3.msra.mxu1 %v1153_v14 }
 0x1a7   : > { %522 = vadd.xlane.f32.xlu1 %v521_v1  ;;  %v515_v12 = vsel %vm379_vm3, %v1358_v2, 0.0  ;;  %961 = vmatprep.subr.mxu1 %v1152_v13 }
 0x1a8   : > { %962 = vmatpush3.msra.mxu1 %v1153_v14 }
 0x1ab   : > { %516 = vadd.xlane.f32.xlu1 %v515_v12 }
 0x20d   : > { %v484_v7 = vpop.xlane.xlu0 %483 }
 0x211   : > { %v478_v8 = vpop.xlane.xlu0 %477  ;;  %v487_v6 = vpop.xlane.xlu1 %486 }
 0x212   : > { %1072 = vrcp.f32 %v478_v8 }
 0x213   : > { %1074 = vrcp.f32 %v487_v6 }
 0x215   : > { %v481_v9 = vpop.xlane.xlu1 %480 }
 0x216   : > { %1076 = vrcp.f32 %v481_v9 }
 0x217   : > { %v496_v10 = vpop.xlane.xlu0 %495  ;;  %1078 = vrcp.f32 %v484_v7  ;;  %v556_v7 = vld [vmem:[#allocation3] sm:$0xff] }
 0x219   : > { %v499_v5 = vpop.xlane.xlu1 %498 }
 0x21b   : > { %v490_v11 = vpop.xlane.xlu0 %489 }
 0x21c   : > { %1080 = vrcp.f32 %v490_v11 }
 0x21d   : > { %1082 = vrcp.f32 %v499_v5  ;;  %v493_v15 = vpop.xlane.xlu1 %492 }
 0x21e   : > { %1084 = vrcp.f32 %v493_v15 }
 0x21f   : > { %v1073_v17 = vpop.eup %1072  ;;  %v508_v3 = vpop.xlane.xlu0 %507  ;;  %1086 = vrcp.f32 %v496_v10 }
 0x220   : > { %v540_v18 = vmul.f32 %v1073_v17, %v1295_v16  ;;  %v1075_v21 = vpop.eup %1074 }
 0x221   : > { %v511_v19 = vpop.xlane.xlu1 %510  ;;  %v543_v29 = vmul.f32 %v1075_v21, %v1298_v20 }
 0x222   : > { %557 = vxpose.xlu1.b32.start [1/16] (narrow) %v540_v18, 8 }
 0x223   : > { %v1077_v22 = vpop.eup %1076  ;;  %v502_v23 = vpop.xlane.xlu0 %501 }
 0x224   : > { %1088 = vrcp.f32 %v502_v23  ;;  %v541_v24 = vmul.f32 %v1077_v22, %v1305_v26  ;;  %v1079_v25 = vpop.eup %1078 }
 0x225   : > { %1090 = vrcp.f32 %v511_v19  ;;  %v505_v27 = vpop.xlane.xlu1 %504  ;;  %v542_v16 = vmul.f32 %v1079_v25, %v1290_v4 }
 0x226   : > { %1092 = vrcp.f32 %v505_v27  ;;  %558 = vxpose.xlu1.b32.cont [2/16] (narrow) %v541_v24, 8  ;;  %v663_v28 = vpack.c.bf16 %v541_v24, %v540_v18 }
 0x227   : > { %1094 = vrcp.f32 %v508_v3  ;;  %v664_v33 = vpack.c.bf16 %v543_v29, %v542_v16  ;;  %v514_v34 = vpop.xlane.xlu0 %513 }
 0x228   : > { %671 = vxpose.xlu0.c.b16.start [1/8] (narrow) %v663_v28, 16  ;;  %1096 = vrcp.f32 %v514_v34 }
 0x229   : > { %v1081_v31 = vpop.eup %1080 }
 0x22a   : > { %v1083_v32 = vpop.eup %1082  ;;  %559 = vxpose.xlu1.b32.cont [3/16] (narrow) %v542_v16, 8  ;;  %v544_v26 = vmul.f32 %v1081_v31, %v1320_v45 }
 0x22b   : > { %v1085_v30 = vpop.eup %1084  ;;  %v547_v20 = vmul.f32 %v1083_v32, %v1315_v42  ;;  %v520_v50 = vpop.xlane.xlu0 %519 }
 0x22c   : > { %672 = vxpose.xlu0.c.b16.cont [2/8] (narrow) %v664_v33, 16  ;;  %v545_v38 = vmul.f32 %v1085_v30, %v1325_v49  ;;  %v1087_v40 = vpop.eup %1086 }
 0x22d   : > { %v546_v4 = vmul.f32 %v1087_v40, %v1311_v35 }
 0x22e   : > { %560 = vxpose.xlu1.b32.cont [4/16] (narrow) %v543_v29, 8  ;;  %v665_v43 = vpack.c.bf16 %v545_v38, %v544_v26 }
 0x22f   : > { %v666_v47 = vpack.c.bf16 %v547_v20, %v546_v4 }
 0x230   : > { %v523_v44 = vpop.xlane.xlu1 %522  ;;  %673 = vxpose.xlu0.c.b16.cont [3/8] (narrow) %v665_v43, 16 }
 0x231   : > { %v1089_v37 = vpop.eup %1088  ;;  %1098 = vrcp.f32 %v523_v44 }
 0x232   : > { %v1091_v46 = vpop.eup %1090  ;;  %561 = vxpose.xlu1.b32.cont [5/16] (narrow) %v544_v26, 8  ;;  %v548_v49 = vmul.f32 %v1089_v37, %v1338_v57 }
 0x233   : > { %v1093_v48 = vpop.eup %1092  ;;  %v551_v35 = vmul.f32 %v1091_v46, %v1334_v55 }
 0x234   : > { %v517_v45 = vpop.xlane.xlu1 %516  ;;  %674 = vxpose.xlu0.c.b16.cont [4/8] (narrow) %v666_v47, 16  ;;  %v549_v51 = vmul.f32 %v1093_v48, %v1342_v58  ;;  %v1095_v42 = vpop.eup %1094 }
 0x235   : > { %1100 = vrcp.f32 %v517_v45  ;;  %v550_v53 = vmul.f32 %v1095_v42, %v1330_v52  ;;  %v1097_v41 = vpop.eup %1096 }
 0x236   : > { %1102 = vrcp.f32 %v520_v50  ;;  %562 = vxpose.xlu1.b32.cont [6/16] (narrow) %v545_v38, 8  ;;  %v667_v36 = vpack.c.bf16 %v549_v51, %v548_v49  ;;  %v552_v57 = vmul.f32 %v1097_v41, %v1346_v60 }
 0x237   : > { %v668_v54 = vpack.c.bf16 %v551_v35, %v550_v53 }
 0x238   : > { %675 = vxpose.xlu0.c.b16.cont [5/8] (narrow) %v667_v36, 16 }
 0x23a   : > { %563 = vxpose.xlu1.b32.cont [7/16] (narrow) %v546_v4, 8 }
 0x23c   : > { %676 = vxpose.xlu0.c.b16.cont [6/8] (narrow) %v668_v54, 16 }
 0x23e   : > { %564 = vxpose.xlu1.b32.cont [8/16] (narrow) %v547_v20, 8  ;;  %v1099_v56 = vpop.eup %1098 }
 0x23f   : > { %v555_v63 = vmul.f32 %v1099_v56, %v1354_v0 }
 0x242   : > { %v1101_v39 = vpop.eup %1100  ;;  %565 = vxpose.xlu1.b32.cont [9/16] (narrow) %v548_v49, 8 }
 0x243   : > { %v553_v58 = vmul.f32 %v1101_v39, %v1358_v2  ;;  %v1103_v59 = vpop.eup %1102  ;;  %v662_v2 = vld [vmem:[#allocation2] sm:$0xff] }
 0x244   : > { %v554_v52 = vmul.f32 %v1103_v59, %v1350_v62 }
 0x245   : > { %v669_v61 = vpack.c.bf16 %v553_v58, %v552_v57 }
 0x246   : > { %566 = vxpose.xlu1.b32.cont [10/16] (narrow) %v549_v51, 8  ;;  %v670_v55 = vpack.c.bf16 %v555_v63, %v554_v52 }
 0x247   : > { %677 = vxpose.xlu0.c.b16.cont [7/8] (narrow) %v669_v61, 16 }
 0x24a   : > { %567 = vxpose.xlu1.b32.cont [11/16] (narrow) %v550_v53, 8 }
 0x24b   : > { %678 = vxpose.xlu0.c.b16.end [8/8] (narrow) %v670_v55, 16 }
 0x24e   : > { %568 = vxpose.xlu1.b32.cont [12/16] (narrow) %v551_v35, 8 }
 0x252   : > { %569 = vxpose.xlu1.b32.cont [13/16] (narrow) %v552_v57, 8 }
 0x256   : > { %570 = vxpose.xlu1.b32.cont [14/16] (narrow) %v553_v58, 8 }
 0x25a   : > { %571 = vxpose.xlu1.b32.cont [15/16] (narrow) %v554_v52, 8 }
 0x25e   : > { %572 = vxpose.xlu1.b32.end [16/16] (narrow) %v555_v63, 8 }
 0x291   : > { %v679_v1 = vpop.trf.xlu0 }
 0x292   : > { %983 = vmatmul.mubr.bf16.vlgmr.msra.gmra.mxu0 %v679_v1 }
 0x29e   : > { %v573_v60 = vpop.trf.xlu1 }
 0x29f   : > { %964 = vmatmul.mubr.f32.vlgmr.msra.gmra.mxu1 %v573_v60 }
 0x352   : > { %v729_v12 = vpop.f32.mrf.mxu0 }
 0x353   : > { %v735_v13 = vadd.f32 %v729_v12, %v662_v2 }
 0x354   : > { %v984_v0 = vpop.f32.mrf.mxu0 }
 0x355   : > { %736 = vst.msk [vmem:[#allocation2] sm:$0xff] %vm254_vm2, %v735_v13 }
 0x356   : > { %v732_v14 = vpop.f32.mrf.mxu0 }
 0x358   : > { %v985_v62 = vpop.f32.mrf.mxu0 }
 0x35e   : > { %740 = sbr.rel (%p875_p8) target bundleno = 1194 (0x4aa), region = 36 }
 0x35f   : > { %v655_v8 = vpop.f32.mrf.mxu1 }
 0x360   : > { %v659_v6 = vadd.f32 %v655_v8, %v556_v7 }
 0x361   : > { %v965_v9 = vpop.f32.mrf.mxu1 }
 0x362   : > { %661 = vst.msk [vmem:[#allocation3] sm:$0xff] %vm660_vm5, %v659_v6 }
 0x363   : > { %v1155_v5 = vmov 0   ;;  %v741_v17 = vld [vmem:[#allocation2] sm:$0xff] }
 0x364   : > { %1104 = vset.pattern.permute.xlu0 %v1155_v5 }
 0x369   : > { %v742_v10 = vld [vmem:[#allocation3] sm:$0xff] }
 0x36a   : > { %v743_v11 = vadd.f32 1e-06, %v742_v10 }
 0x36c   : > { %1105 = vrcp.f32 %v743_v11 }
 0x379   : > { %v1106_v15 = vpop.eup %1105 }
 0x37a   : > { %747 = vperm.xlu0 %1104, %v1106_v15  }
 0x3f5   : > { %v748_v3 = vpop.permute.xlu0 %747 }
 0x3f6   : > { %v750_v18 = vmul.f32 %v748_v3, %v741_v17 }
 0x3f8   : > { %v751_v19 = vmul.f32 %v750_v18, %v750_v18 }
 0x3fa   : > { %v752_v21 = vsel %vm254_vm2, %v751_v19, 0.0 }
 0x3fb   : > { %753 = vadd.xlane.f32.xlu0 %v752_v21 }
 0x484   : > { %v754_v22 = vpop.xlane.xlu0 %753 }
 0x485   : > { %1107 = vrsqrt.f32 %v754_v22  ;;  %vm757_vm6 = vcmp.eq.f32.partialorder %v754_v22, inf  ;;  %v760_v25 = vand.u32 2147483648, %v754_v22  ;;  %vm759_vm7 = vcmp.eq.f32.partialorder %v754_v22, 0.0 }
 0x492   : > { %v1108_v23 = vpop.eup %1107 }
 0x493   : > { %v756_v24 = vmul.f32 %v1108_v23, %v754_v22 }
 0x495   : > { %v758_v27 = vsel %vm757_vm6, %v754_v22, %v756_v24 }
 0x496   : > { %v761_v28 = vsel %vm759_vm7, %v760_v25, %v758_v27 }
 0x497   : > { %v762_v29 = vadd.f32 1e-06, %v761_v28 }
 0x499   : > { %1109 = vrcp.f32 %v762_v29 }
 0x4a6   : > { %v1110_v16 = vpop.eup %1109 }
 0x4a7   : > { %v764_v31 = vmul.f32 %v1110_v16, %v750_v18 }
 0x4a9   : > { %765 = vst.msk [vmem:[%s1210_s26] sm:$0xff] %vm254_vm2, %v764_v31 }
 0x4aa PF: > { %s12_s13 = sadd.s32 1, %s1149_s13   ;;  %s1409_s9 = smov %s1141_s11 }
 0x4ab   : > { %p9_p9 = scmp.ge.s32.totalorder %s12_s13, 6   ;;  %s1410_s10 = smov %s1145_s12 }
 0x4ac   : > { %s1411_s11 = smov %s1414_s14  ;;  %s1412_s12 = smov %s1418_s15 }
 0x4ad   :  { %11 = sbr.rel (!%p9_p9) target bundleno = 3 (0x3), region = 69 }

// kernel: emau_forward.9
= control target key start
LH: loop header
LB: loop body
LE: loop exit
PB: predicated region body
PF: predicated region fallthrough
CT: control target
= control target key end

     0   :  { %s1535_s21 = smov 0   ;;  %s1537_s22 = smov 0   ;;  %s1853_s0 = inlined_call_operand.vmem [shape: f32[2,256,4], index: 0, kind: input, shape index: {}]   ;;  %s1854_s1 = inlined_call_operand.vmem [shape: bf16[2,256,4], index: 1, kind: input, shape index: {}]   ;;  %s1855_s2 = inlined_call_operand.vmem [shape: f32[2,8,4], index: 2, kind: input, shape index: {}]   ;;  %s1856_s3 = inlined_call_operand.vmem [shape: f32[2,8,4], index: 3, kind: input, shape index: {}]   ;;  %s1857_s4 = inlined_call_operand.vmem [shape: bf16[4,4], index: 4, kind: input, shape index: {}]   ;;  %s1858_s5 = inlined_call_operand.vmem [shape: f32[1,4], index: 5, kind: input, shape index: {}]   ;;  %s1859_s6 = inlined_call_operand.vmem [shape: f32[2,256,4], index: 6, kind: output, shape index: {}]  }
   0x1   :  { %s1539_s23 = smov 0   ;;  %s1541_s24 = smov 0  }
   0x2   :  { %s1543_s25 = smov 0  }
   0x3 LB: > { %s25_s26 = sadd.s32 1, %s1490_s23  ;;  %s28_s27 = sadd.s32 1, %s1494_s24  ;;  %s1498_s25 = sphi %s1543_s25, %s16_s25   ;;  %s1494_s24 = sphi %s1541_s24, %s1863_s24   ;;  %s1490_s23 = sphi %s1539_s23, %s1862_s23   ;;  %s1486_s22 = sphi %s1537_s22, %s1861_s22   ;;  %s1482_s21 = sphi %s1535_s21, %s1860_s21  }
   0x4   : > { %p26_p0 = scmp.ge.s32.totalorder %s25_s26, 2  ;;  %p1214_p1 = scmp.ge.s32.totalorder %s1498_s25, 1 }
   0x5   : > { %p268_p2 = scmp.lt.s32.totalorder %s1498_s25, 5 }
   0x6   : > { %s1865_s26 = smov (%p26_p0, %s25_s26), 0  ;;  %s1867_s27 = smov (!%p26_p0, %s28_s27), %s1494_s24 }
   0x7   : > { %p269_p3 = pnand %p1214_p1, %p268_p2  ;;  %p30_p4 = scmp.ge.s32.totalorder %s1867_s27, 2 }
   0x8   : > { %s1215_s28 = sshll.u32 (!%p269_p3), %s1482_s21, 4  ;;  %p324_p5 = scmp.lt.s32.totalorder (!%p269_p3), %s1486_s22, 1 }
   0x9   : > { %s1869_s27 = smov (%p30_p4, %s1867_s27), 0  ;;  %272 = sbr.rel (%p269_p3) target bundleno = 980 (0x3d4), region = 44 }
   0xa   : > { %p326_p6 = scmp.lt.s32.totalorder (!%p269_p3), %s1215_s28, 31 }
   0xe   : > { %s1871_s22 = smov (!%p324_p5, %s1486_s22), 1  ;;  %s1873_s28 = smov (!%p326_p6, %s1215_s28), 31  ;;  %vm422_vm0 = vcmask 31744   ;;  %vm547_vm1 = vcmask 64512   ;;  %vm756_vm2 = vcmask 1043456   ;;  %vm913_vm3 = vcmask 1041408  }
   0xf   : > { %s1216_s29 = sshll.u32 %s1871_s22, 5  ;;  %s1221_s30 = sshll.u32 %s1871_s22, 3 }
  0x10   : > { %s1569_s7 = sadd.s32 %s1216_s29, %s1873_s28  ;;  %s346_s10 = scalar_lea.vmem %s1855_s2, %s1221_s30 }
  0x11   : > { %s1220_s11 = sshll.u32 %s1569_s7, 2  ;;  %v378_v0 = vld [vmem:[%s346_s10] sm:$0xff]  ;;  %s350_s17 = scalar_lea.vmem %s1856_s3, %s1221_s30 }
  0x12   : > { %s341_s14 = scalar_lea.vmem %s1854_s1, %s1220_s11  ;;  %v379_v1 = vpack.c.bf16 %v378_v0, %v378_v0  ;;  %v380_v43 = vld [vmem:[%s350_s17] sm:$0xff]  ;;  %s1217_s20 = sshll.u32 %s1569_s7, 3 }
  0x13   : > { %v1388_v2 = vld [vmem:[%s341_s14] sm:$0xff]   ;;  %v1389_v4 = vld [vmem:[%s341_s14 + $0x8] sm:$0xff]   ;;  %v1390_v5 = vld [vmem:[%s341_s14 + $0x10] sm:$0xff]   ;;  %v381_v44 = vpack.c.bf16 %v380_v43, %v380_v43  ;;  %s1762_s28 = scalar_lea.vmem %s1853_s0, %s1217_s20  ;;  %s1776_s9 = scalar_lea.vmem %s1859_s6, %s1217_s20 }
  0x14   : > { %1344 = vmatprep.subr.msk.bf16.mxu0 %vm422_vm0, %v379_v1  ;;  %v448_v3 = vsel %vm422_vm0, %v379_v1, 0  ;;  %1290 = vmatprep.mubr.msk.bf16.mxu0 %vm422_vm0, %v1388_v2  ;;  %v1391_v6 = vld [vmem:[%s341_s14 + $0x18] sm:$0xff]   ;;  %v1392_v7 = vld [vmem:[%s341_s14 + $0x20] sm:$0xff]   ;;  %v1393_v8 = vld [vmem:[%s341_s14 + $0x28] sm:$0xff]  }
  0x15   : > { %1289 = vmatpush3.bf16.xpose.msra.mxu0 %v448_v3  ;;  %v1394_v9 = vld [vmem:[%s341_s14 + $0x30] sm:$0xff]   ;;  %v1395_v10 = vld [vmem:[%s341_s14 + $0x38] sm:$0xff]   ;;  %v758_v45 = vsel %vm756_vm2, %v381_v44, 0  ;;  %1346 = vmatprep.subr.msk.bf16.mxu1 %vm756_vm2, %v381_v44 }
  0x16   : > { %1345 = vmatprep.subr.msk.bf16.mxu0 %vm756_vm2, %v381_v44  ;;  %1343 = vmatpush3.bf16.msra.mxu1 %v758_v45 }
  0x1c   : > { %1291 = vmatmul.mubr.msk.bf16.vlgmr.msra.gmra.mxu0 %vm422_vm0, %v1389_v4 }
  0x1d   : > { %1294 = vmatprep.mubr.msk.bf16.mxu0 %vm422_vm0, %v1390_v5  ;;  %1307 = vmatpush3.bf16.msra.mxu0 %v758_v45 }
  0x24   : > { %1295 = vmatmul.mubr.msk.bf16.gmra.mxu0 %vm422_vm0, %v1391_v6 }
  0x25   : > { %1298 = vmatprep.mubr.msk.bf16.mxu0 %vm422_vm0, %v1392_v7 }
  0x2c   : > { %1299 = vmatmul.mubr.msk.bf16.gmra.mxu0 %vm422_vm0, %v1393_v8 }
  0x2d   : > { %1302 = vmatprep.mubr.msk.bf16.mxu0 %vm422_vm0, %v1394_v9 }
  0x34   : > { %1303 = vmatmul.mubr.msk.bf16.gmra.mxu0 %vm422_vm0, %v1395_v10 }
  0xdc   : > { %v1292_v11 = vpop.f32.mrf.mxu0 }
  0xdd   : > { %v554_v12 = vsel %vm547_vm1, %v1292_v11, -inf }
  0xde   : > { %555 = vmax.xlane.f32.xlu1 %v554_v12  ;;  %v484_v13 = vpop.f32.mrf.mxu0 }
  0xdf   : > { %v548_v14 = vsel %vm547_vm1, %v484_v13, -inf }
  0xe0   : > { %549 = vmax.xlane.f32.xlu0 %v548_v14  ;;  %v1592_v15 = vpop.f32.mrf.mxu0 }
  0xe1   : > { %v557_v16 = vsel %vm547_vm1, %v1592_v15, -inf }
  0xe2   : > { %558 = vmax.xlane.f32.xlu1 %v557_v16  ;;  %v487_v17 = vpop.f32.mrf.mxu0 }
  0xe3   : > { %v551_v18 = vsel %vm547_vm1, %v487_v17, -inf }
  0xe4   : > { %552 = vmax.xlane.f32.xlu0 %v551_v18  ;;  %v1597_v19 = vpop.f32.mrf.mxu0 }
  0xe5   : > { %v566_v24 = vsel %vm547_vm1, %v1597_v19, -inf }
  0xe6   : > { %v500_v20 = vpop.f32.mrf.mxu0 }
  0xe7   : > { %v560_v21 = vsel %vm547_vm1, %v500_v20, -inf }
  0xe8   : > { %561 = vmax.xlane.f32.xlu0 %v560_v21  ;;  %v1600_v22 = vpop.f32.mrf.mxu0 }
  0xe9   : > { %v569_v28 = vsel %vm547_vm1, %v1600_v22, -inf }
  0xea   : > { %v1602_v23 = vpop.f32.mrf.mxu0 }
  0xeb   : > { %v563_v25 = vsel %vm547_vm1, %v1602_v23, -inf }
  0xec   : > { %567 = vmax.xlane.f32.xlu0 %v566_v24  ;;  %564 = vmax.xlane.f32.xlu1 %v563_v25  ;;  %v1608_v26 = vpop.f32.mrf.mxu0 }
  0xed   : > { %v578_v32 = vsel %vm547_vm1, %v1608_v26, -inf }
  0xee   : > { %v1610_v27 = vpop.f32.mrf.mxu0 }
  0xef   : > { %v572_v29 = vsel %vm547_vm1, %v1610_v27, -inf }
  0xf0   : > { %570 = vmax.xlane.f32.xlu1 %v569_v28  ;;  %573 = vmax.xlane.f32.xlu0 %v572_v29  ;;  %v1616_v30 = vpop.f32.mrf.mxu0 }
  0xf1   : > { %v581_v36 = vsel %vm547_vm1, %v1616_v30, -inf }
  0xf2   : > { %v1618_v31 = vpop.f32.mrf.mxu0 }
  0xf3   : > { %v575_v33 = vsel %vm547_vm1, %v1618_v31, -inf }
  0xf4   : > { %579 = vmax.xlane.f32.xlu0 %v578_v32  ;;  %576 = vmax.xlane.f32.xlu1 %v575_v33  ;;  %v1624_v34 = vpop.f32.mrf.mxu0 }
  0xf5   : > { %v590_v40 = vsel %vm547_vm1, %v1624_v34, -inf }
  0xf6   : > { %v1626_v35 = vpop.f32.mrf.mxu0 }
  0xf7   : > { %v584_v37 = vsel %vm547_vm1, %v1626_v35, -inf }
  0xf8   : > { %582 = vmax.xlane.f32.xlu1 %v581_v36  ;;  %585 = vmax.xlane.f32.xlu0 %v584_v37  ;;  %v1632_v38 = vpop.f32.mrf.mxu0 }
  0xf9   : > { %v593_v42 = vsel %vm547_vm1, %v1632_v38, -inf }
  0xfa   : > { %v1634_v39 = vpop.f32.mrf.mxu0 }
  0xfb   : > { %v587_v41 = vsel %vm547_vm1, %v1634_v39, -inf }
  0xfc   : > { %591 = vmax.xlane.f32.xlu0 %v590_v40  ;;  %588 = vmax.xlane.f32.xlu1 %v587_v41 }
 0x100   : > { %594 = vmax.xlane.f32.xlu1 %v593_v42 }
 0x167   : > { %v556_v46 = vpop.xlane.xlu1 %555 }
 0x168   : > { %v598_v47 = vsub.f32 %v1292_v11, %v556_v46 }
 0x169   : > { %v550_v48 = vpop.xlane.xlu0 %549 }
 0x16a   : > { %v596_v49 = vsub.f32 %v484_v13, %v550_v48  ;;  %v616_v51 = vmul.f32 1.442695, %v598_v47 }
 0x16b   : > { %v559_v50 = vpop.xlane.xlu1 %558 }
 0x16c   : > { %v612_v52 = vmul.f32 1.442695, %v596_v49  ;;  %v599_v53 = vsub.f32 %v1592_v15, %v559_v50 }
 0x16d   : > { %v553_v54 = vpop.xlane.xlu0 %552 }
 0x16e   : > { %1396 = vpow2.f32 %v612_v52  ;;  %v597_v55 = vsub.f32 %v487_v17, %v553_v54  ;;  %v618_v56 = vmul.f32 1.442695, %v599_v53 }
 0x16f   : > { %1398 = vpow2.f32 %v616_v51 }
 0x170   : > { %v614_v57 = vmul.f32 1.442695, %v597_v55 }
 0x171   : > { %v562_v58 = vpop.xlane.xlu0 %561 }
 0x172   : > { %1400 = vpow2.f32 %v614_v57  ;;  %v600_v59 = vsub.f32 %v500_v20, %v562_v58 }
 0x173   : > { %1402 = vpow2.f32 %v618_v56 }
 0x174   : > { %v620_v60 = vmul.f32 1.442695, %v600_v59 }
 0x175   : > { %v568_v61 = vpop.xlane.xlu0 %567  ;;  %v565_v62 = vpop.xlane.xlu1 %564 }
 0x176   : > { %1404 = vpow2.f32 %v620_v60  ;;  %v602_v63 = vsub.f32 %v1597_v19, %v568_v61  ;;  %v601_v0 = vsub.f32 %v1602_v23, %v565_v62  ;;  %v881_v62 = vld [vmem:[%s1857_s4] sm:$0x3] }
 0x177   : > { %1347 = vmatprep.subr.msk.bf16.mxu1 %vm913_vm3, %v881_v62 }
 0x178   : > { %v624_v1 = vmul.f32 1.442695, %v602_v63  ;;  %v622_v2 = vmul.f32 1.442695, %v601_v0  ;;  %v915_v63 = vsel %vm913_vm3, %v881_v62, 0 }
 0x179   : > { %v571_v3 = vpop.xlane.xlu1 %570  ;;  %v574_v4 = vpop.xlane.xlu0 %573 }
 0x17a   : > { %1406 = vpow2.f32 %v624_v1  ;;  %v603_v5 = vsub.f32 %v1600_v22, %v571_v3  ;;  %v604_v6 = vsub.f32 %v1610_v27, %v574_v4 }
 0x17b   : > { %v1652_v7 = vpop.eup %1396  ;;  %1408 = vpow2.f32 %v622_v2 }
 0x17c   : > { %v626_v8 = vmul.f32 1.442695, %v603_v5  ;;  %v628_v9 = vmul.f32 1.442695, %v604_v6  ;;  %v644_v10 = vsel %vm547_vm1, %v1652_v7, 0.0  ;;  %v1656_v11 = vpop.eup %1398 }
 0x17d   : > { %v580_v12 = vpop.xlane.xlu0 %579  ;;  %v577_v13 = vpop.xlane.xlu1 %576  ;;  %645 = vadd.xlane.f32.xlu0 %v644_v10  ;;  %v650_v19 = vsel %vm547_vm1, %v1656_v11, 0.0 }
 0x17e   : > { %1410 = vpow2.f32 %v626_v8  ;;  %v606_v14 = vsub.f32 %v1608_v26, %v580_v12  ;;  %v605_v15 = vsub.f32 %v1618_v31, %v577_v13 }
 0x17f   : > { %v1660_v16 = vpop.eup %1400  ;;  %1412 = vpow2.f32 %v628_v9 }
 0x180   : > { %v632_v17 = vmul.f32 1.442695, %v606_v14  ;;  %v630_v18 = vmul.f32 1.442695, %v605_v15  ;;  %v647_v20 = vsel %vm547_vm1, %v1660_v16, 0.0  ;;  %v1666_v21 = vpop.eup %1402 }
 0x181   : > { %v583_v22 = vpop.xlane.xlu1 %582  ;;  %651 = vadd.xlane.f32.xlu0 %v650_v19  ;;  %v586_v23 = vpop.xlane.xlu0 %585  ;;  %648 = vadd.xlane.f32.xlu1 %v647_v20  ;;  %v653_v31 = vsel %vm547_vm1, %v1666_v21, 0.0 }
 0x182   : > { %1414 = vpow2.f32 %v632_v17  ;;  %v607_v24 = vsub.f32 %v1616_v30, %v583_v22  ;;  %v608_v25 = vsub.f32 %v1626_v35, %v586_v23 }
 0x183   : > { %v1670_v26 = vpop.eup %1404  ;;  %1416 = vpow2.f32 %v630_v18 }
 0x184   : > { %v634_v27 = vmul.f32 1.442695, %v607_v24  ;;  %v636_v28 = vmul.f32 1.442695, %v608_v25  ;;  %v656_v29 = vsel %vm547_vm1, %v1670_v26, 0.0 }
 0x185   : > { %657 = vadd.xlane.f32.xlu0 %v656_v29  ;;  %v592_v32 = vpop.xlane.xlu0 %591  ;;  %654 = vadd.xlane.f32.xlu1 %v653_v31  ;;  %v589_v33 = vpop.xlane.xlu1 %588 }
 0x186   : > { %1418 = vpow2.f32 %v634_v27  ;;  %v610_v30 = vsub.f32 %v1624_v34, %v592_v32  ;;  %v609_v35 = vsub.f32 %v1634_v39, %v589_v33 }
 0x187   : > { %v1678_v36 = vpop.eup %1406  ;;  %1420 = vpow2.f32 %v636_v28 }
 0x188   : > { %v1680_v37 = vpop.eup %1408  ;;  %v640_v40 = vmul.f32 1.442695, %v610_v30  ;;  %v638_v41 = vmul.f32 1.442695, %v609_v35  ;;  %v662_v42 = vsel %vm547_vm1, %v1678_v36, 0.0 }
 0x189   : > { %663 = vadd.xlane.f32.xlu0 %v662_v42  ;;  %v659_v43 = vsel %vm547_vm1, %v1680_v37, 0.0  ;;  %v595_v44 = vpop.xlane.xlu1 %594 }
 0x18a   : > { %1422 = vpow2.f32 %v640_v40  ;;  %660 = vadd.xlane.f32.xlu1 %v659_v43  ;;  %v611_v34 = vsub.f32 %v1632_v38, %v595_v44 }
 0x18b   : > { %v1687_v39 = vpop.eup %1410  ;;  %1424 = vpow2.f32 %v638_v41 }
 0x18c   : > { %v1689_v45 = vpop.eup %1412  ;;  %v642_v46 = vmul.f32 1.442695, %v611_v34  ;;  %v665_v47 = vsel %vm547_vm1, %v1687_v39, 0.0 }
 0x18d   : > { %v668_v48 = vsel %vm547_vm1, %v1689_v45, 0.0 }
 0x18e   : > { %1426 = vpow2.f32 %v642_v46  ;;  %669 = vadd.xlane.f32.xlu0 %v668_v48  ;;  %666 = vadd.xlane.f32.xlu1 %v665_v47 }
 0x18f   : > { %v1695_v49 = vpop.eup %1414 }
 0x190   : > { %v1697_v50 = vpop.eup %1416  ;;  %v674_v38 = vsel %vm547_vm1, %v1695_v49, 0.0 }
 0x191   : > { %v671_v51 = vsel %vm547_vm1, %v1697_v50, 0.0 }
 0x192   : > { %675 = vadd.xlane.f32.xlu0 %v674_v38  ;;  %672 = vadd.xlane.f32.xlu1 %v671_v51 }
 0x193   : > { %v1703_v52 = vpop.eup %1418 }
 0x194   : > { %v1705_v53 = vpop.eup %1420  ;;  %v677_v54 = vsel %vm547_vm1, %v1703_v52, 0.0 }
 0x195   : > { %v680_v55 = vsel %vm547_vm1, %v1705_v53, 0.0 }
 0x196   : > { %681 = vadd.xlane.f32.xlu0 %v680_v55  ;;  %678 = vadd.xlane.f32.xlu1 %v677_v54 }
 0x197   : > { %v1711_v56 = vpop.eup %1422 }
 0x198   : > { %v1713_v57 = vpop.eup %1424  ;;  %v686_v58 = vsel %vm547_vm1, %v1711_v56, 0.0 }
 0x199   : > { %v683_v59 = vsel %vm547_vm1, %v1713_v57, 0.0 }
 0x19a   : > { %687 = vadd.xlane.f32.xlu0 %v686_v58  ;;  %684 = vadd.xlane.f32.xlu1 %v683_v59 }
 0x19b   : > { %v1719_v60 = vpop.eup %1426 }
 0x19c   : > { %v689_v61 = vsel %vm547_vm1, %v1719_v60, 0.0 }
 0x19e   : > { %690 = vadd.xlane.f32.xlu1 %v689_v61 }
 0x206   : > { %v646_v0 = vpop.xlane.xlu0 %645 }
 0x207   : > { %1428 = vrcp.f32 %v646_v0 }
 0x20a   : > { %v652_v1 = vpop.xlane.xlu0 %651  ;;  %v649_v2 = vpop.xlane.xlu1 %648 }
 0x20b   : > { %1430 = vrcp.f32 %v649_v2 }
 0x20c   : > { %1432 = vrcp.f32 %v652_v1 }
 0x20e   : > { %v658_v3 = vpop.xlane.xlu0 %657  ;;  %v655_v4 = vpop.xlane.xlu1 %654 }
 0x20f   : > { %1434 = vrcp.f32 %v655_v4 }
 0x210   : > { %1436 = vrcp.f32 %v658_v3 }
 0x212   : > { %v664_v5 = vpop.xlane.xlu0 %663 }
 0x213   : > { %v661_v6 = vpop.xlane.xlu1 %660 }
 0x214   : > { %1438 = vrcp.f32 %v661_v6  ;;  %v1429_v8 = vpop.eup %1428 }
 0x215   : > { %1440 = vrcp.f32 %v664_v5  ;;  %v708_v13 = vmul.f32 %v1429_v8, %v1652_v7 }
 0x217   : > { %v670_v9 = vpop.xlane.xlu0 %669  ;;  %v667_v10 = vpop.xlane.xlu1 %666 }
 0x218   : > { %v1431_v12 = vpop.eup %1430  ;;  %1442 = vrcp.f32 %v667_v10 }
 0x219   : > { %v709_v14 = vmul.f32 %v1431_v12, %v1660_v16  ;;  %v1433_v15 = vpop.eup %1432  ;;  %1444 = vrcp.f32 %v670_v9 }
 0x21a   : > { %v710_v22 = vmul.f32 %v1433_v15, %v1656_v11 }
 0x21b   : > { %v676_v17 = vpop.xlane.xlu0 %675  ;;  %v673_v18 = vpop.xlane.xlu1 %672  ;;  %v724_v19 = vpack.c.bf16 %v709_v14, %v708_v13 }
 0x21c   : > { %v1435_v20 = vpop.eup %1434  ;;  %1446 = vrcp.f32 %v673_v18 }
 0x21d   : > { %v711_v23 = vmul.f32 %v1435_v20, %v1666_v21  ;;  %1308 = vmatprep.mubr.msk.bf16.mxu0 %vm547_vm1, %v724_v19  ;;  %v1437_v24 = vpop.eup %1436  ;;  %1448 = vrcp.f32 %v676_v17 }
 0x21e   : > { %v712_v16 = vmul.f32 %v1437_v24, %v1670_v26 }
 0x21f   : > { %v682_v25 = vpop.xlane.xlu0 %681  ;;  %v679_v27 = vpop.xlane.xlu1 %678  ;;  %v725_v7 = vpack.c.bf16 %v711_v23, %v710_v22 }
 0x220   : > { %1450 = vrcp.f32 %v679_v27 }
 0x221   : > { %v1439_v28 = vpop.eup %1438  ;;  %1309 = vmatmul.mubr.msk.bf16.vlgmr.msra.gmra.mxu0 %vm547_vm1, %v725_v7  ;;  %1452 = vrcp.f32 %v682_v25 }
 0x222   : > { %v713_v29 = vmul.f32 %v1439_v28, %v1680_v37  ;;  %v1441_v32 = vpop.eup %1440 }
 0x223   : > { %v688_v31 = vpop.xlane.xlu0 %687  ;;  %v685_v11 = vpop.xlane.xlu1 %684  ;;  %v714_v35 = vmul.f32 %v1441_v32, %v1678_v36 }
 0x224   : > { %v726_v21 = vpack.c.bf16 %v713_v29, %v712_v16  ;;  %1454 = vrcp.f32 %v685_v11 }
 0x225   : > { %v1443_v33 = vpop.eup %1442  ;;  %1456 = vrcp.f32 %v688_v31 }
 0x226   : > { %1312 = vmatprep.mubr.msk.bf16.mxu1 %vm547_vm1, %v726_v21  ;;  %v715_v40 = vmul.f32 %v1443_v33, %v1687_v39  ;;  %v1445_v41 = vpop.eup %1444 }
 0x227   : > { %v691_v30 = vpop.xlane.xlu1 %690  ;;  %v716_v37 = vmul.f32 %v1445_v41, %v1689_v45 }
 0x228   : > { %1458 = vrcp.f32 %v691_v30  ;;  %v727_v26 = vpack.c.bf16 %v715_v40, %v714_v35  ;;  %v1767_v30 = vld [vmem:[%s1858_s5] ss:$0 sm:$0xff]  ;;  %v1016_v40 = vld [vmem:[%s1762_s28 + $0x10] sm:$0xff] }
 0x229   : > { %v1447_v42 = vpop.eup %1446 }
 0x22a   : > { %1313 = vmatmul.mubr.msk.bf16.vlgmr.msra.gmra.mxu1 %vm547_vm1, %v727_v26  ;;  %v717_v43 = vmul.f32 %v1447_v42, %v1697_v50  ;;  %v1449_v44 = vpop.eup %1448  ;;  %v1014_v42 = vld [vmem:[%s1762_s28] sm:$0xff] }
 0x22b   : > { %1325 = vmatpush3.bf16.msra.mxu1 %v915_v63  ;;  %v718_v36 = vmul.f32 %v1449_v44, %v1695_v49 }
 0x22c   : > { %v728_v34 = vpack.c.bf16 %v717_v43, %v716_v37 }
 0x22d   : > { %v1451_v46 = vpop.eup %1450 }
 0x22e   : > { %1316 = vmatprep.mubr.msk.bf16.mxu1 %vm547_vm1, %v728_v34  ;;  %v719_v39 = vmul.f32 %v1451_v46, %v1703_v52  ;;  %v1453_v47 = vpop.eup %1452  ;;  %v1017_v34 = vld [vmem:[%s1762_s28 + $0x18] sm:$0xff] }
 0x22f   : > { %v720_v45 = vmul.f32 %v1453_v47, %v1705_v53 }
 0x230   : > { %v729_v48 = vpack.c.bf16 %v719_v39, %v718_v36 }
 0x231   : > { %v1455_v38 = vpop.eup %1454 }
 0x232   : > { %v1457_v51 = vpop.eup %1456  ;;  %1317 = vmatmul.mubr.msk.bf16.gmra.mxu1 %vm547_vm1, %v729_v48  ;;  %v721_v50 = vmul.f32 %v1455_v38, %v1713_v57  ;;  %v1015_v48 = vld [vmem:[%s1762_s28 + $0x8] sm:$0xff] }
 0x233   : > { %v722_v58 = vmul.f32 %v1457_v51, %v1711_v56 }
 0x234   : > { %v730_v55 = vpack.c.bf16 %v721_v50, %v720_v45 }
 0x235   : > { %v1459_v54 = vpop.eup %1458 }
 0x236   : > { %v723_v59 = vmul.f32 %v1459_v54, %v1719_v60  ;;  %1320 = vmatprep.mubr.msk.bf16.mxu1 %vm547_vm1, %v730_v55 }
 0x238   : > { %v731_v49 = vpack.c.bf16 %v723_v59, %v722_v58  ;;  %v1020_v58 = vld [vmem:[%s1762_s28 + $0x30] sm:$0xff] }
 0x23a   : > { %1321 = vmatmul.mubr.msk.bf16.gmra.mxu1 %vm547_vm1, %v731_v49 }
 0x2e1   : > { %v1310_v52 = vpop.f32.mrf.mxu0 }
 0x2e2   : > { %v859_v2 = vmax.f32 %v1310_v52, 0.0 }
 0x2e3   : > { %v794_v61 = vpop.f32.mrf.mxu0 }
 0x2e4   : > { %v857_v1 = vmax.f32 %v794_v61, 0.0  ;;  %v1018_v61 = vld [vmem:[%s1762_s28 + $0x20] sm:$0xff] }
 0x2e5   : > { %v1311_v62 = vpop.f32.mrf.mxu0 }
 0x2e6   : > { %v860_v63 = vmax.f32 %v1311_v62, 0.0 }
 0x2e7   : > { %v797_v0 = vpop.f32.mrf.mxu0 }
 0x2e8   : > { %v858_v53 = vmax.f32 %v797_v0, 0.0  ;;  %v874_v4 = vpack.c.bf16 %v860_v63, %v859_v2 }
 0x2ea   : > { %v873_v57 = vpack.c.bf16 %v858_v53, %v857_v1  ;;  %v1314_v3 = vpop.f32.mrf.mxu1  ;;  %v1021_v1 = vld [vmem:[%s1762_s28 + $0x38] sm:$0xff] }
 0x2eb   : > { %v863_v10 = vmax.f32 %v1314_v3, 0.0 }
 0x2ec   : > { %v810_v5 = vpop.f32.mrf.mxu1  ;;  %1326 = vmatprep.mubr.msk.bf16.mxu1 %vm422_vm0, %v873_v57 }
 0x2ed   : > { %1327 = vmatmul.mubr.msk.bf16.vlgmr.msra.gmra.mxu1 %vm422_vm0, %v874_v4  ;;  %v861_v8 = vmax.f32 %v810_v5, 0.0  ;;  %v1019_v4 = vld [vmem:[%s1762_s28 + $0x28] sm:$0xff] }
 0x2ee   : > { %v1315_v56 = vpop.f32.mrf.mxu1 }
 0x2ef   : > { %v864_v60 = vmax.f32 %v1315_v56, 0.0 }
 0x2f0   : > { %v813_v6 = vpop.f32.mrf.mxu1 }
 0x2f1   : > { %v862_v9 = vmax.f32 %v813_v6, 0.0  ;;  %v876_v14 = vpack.c.bf16 %v864_v60, %v863_v10 }
 0x2f2   : > { %v1318_v12 = vpop.f32.mrf.mxu1 }
 0x2f3   : > { %v875_v13 = vpack.c.bf16 %v862_v9, %v861_v8  ;;  %v867_v23 = vmax.f32 %v1318_v12, 0.0  ;;  %v1024_v8 = vld [vmem:[%s1762_s28 + $0x50] sm:$0xff] }
 0x2f4   : > { %v826_v15 = vpop.f32.mrf.mxu1 }
 0x2f5   : > { %1330 = vmatprep.mubr.msk.bf16.mxu1 %vm422_vm0, %v875_v13  ;;  %v865_v20 = vmax.f32 %v826_v15, 0.0 }
 0x2f6   : > { %v1319_v17 = vpop.f32.mrf.mxu1  ;;  %1331 = vmatmul.mubr.msk.bf16.gmra.mxu1 %vm422_vm0, %v876_v14  ;;  %v1022_v14 = vld [vmem:[%s1762_s28 + $0x40] sm:$0xff] }
 0x2f7   : > { %v868_v18 = vmax.f32 %v1319_v17, 0.0 }
 0x2f8   : > { %v829_v19 = vpop.f32.mrf.mxu1 }
 0x2f9   : > { %v866_v22 = vmax.f32 %v829_v19, 0.0  ;;  %v878_v27 = vpack.c.bf16 %v868_v18, %v867_v23 }
 0x2fa   : > { %v1322_v24 = vpop.f32.mrf.mxu1 }
 0x2fb   : > { %v877_v25 = vpack.c.bf16 %v866_v22, %v865_v20  ;;  %v871_v32 = vmax.f32 %v1322_v24, 0.0  ;;  %v1025_v20 = vld [vmem:[%s1762_s28 + $0x58] sm:$0xff] }
 0x2fc   : > { %v842_v7 = vpop.f32.mrf.mxu1 }
 0x2fd   : > { %1334 = vmatprep.mubr.msk.bf16.mxu1 %vm422_vm0, %v877_v25  ;;  %v869_v31 = vmax.f32 %v842_v7, 0.0 }
 0x2fe   : > { %v1323_v28 = vpop.f32.mrf.mxu1  ;;  %1335 = vmatmul.mubr.msk.bf16.gmra.mxu1 %vm422_vm0, %v878_v27  ;;  %v1023_v27 = vld [vmem:[%s1762_s28 + $0x48] sm:$0xff] }
 0x2ff   : > { %v872_v16 = vmax.f32 %v1323_v28, 0.0 }
 0x300   : > { %v845_v29 = vpop.f32.mrf.mxu1 }
 0x301   : > { %v870_v11 = vmax.f32 %v845_v29, 0.0  ;;  %v880_v33 = vpack.c.bf16 %v872_v16, %v871_v32 }
 0x303   : > { %v879_v21 = vpack.c.bf16 %v870_v11, %v869_v31  ;;  %v1028_v31 = vld [vmem:[%s1762_s28 + $0x70] sm:$0xff] }
 0x305   : > { %1338 = vmatprep.mubr.msk.bf16.mxu1 %vm422_vm0, %v879_v21 }
 0x306   : > { %1339 = vmatmul.mubr.msk.bf16.gmra.mxu1 %vm422_vm0, %v880_v33 }
 0x3ad   : > { %v1328_v35 = vpop.f32.mrf.mxu1 }
 0x3ae   : > { %v960_v41 = vadd.f32 %v1328_v35, %v1767_v30  ;;  %v1026_v35 = vld [vmem:[%s1762_s28 + $0x60] sm:$0xff] }
 0x3af   : > { %v951_v26 = vpop.f32.mrf.mxu1 }
 0x3b0   : > { %v1032_v37 = vadd.f32 %v1016_v40, %v960_v41  ;;  %v952_v43 = vadd.f32 %v1767_v30, %v951_v26 }
 0x3b1   : > { %v1329_v44 = vpop.f32.mrf.mxu1 }
 0x3b2   : > { %v1048_v46 = vmax.f32 %v1032_v37, 0.0  ;;  %v1030_v36 = vadd.f32 %v1014_v42, %v952_v43  ;;  %v963_v39 = vadd.f32 %v1329_v44, %v1767_v30  ;;  %v1029_v37 = vld [vmem:[%s1762_s28 + $0x78] sm:$0xff] }
 0x3b3   : > { %v954_v47 = vpop.f32.mrf.mxu1 }
 0x3b4   : > { %1064 = vst.msk [vmem:[%s1776_s9 + $0x10] sm:$0xff] %vm422_vm0, %v1048_v46  ;;  %v1046_v38 = vmax.f32 %v1030_v36, 0.0  ;;  %v1033_v51 = vadd.f32 %v1017_v34, %v963_v39  ;;  %v955_v45 = vadd.f32 %v1767_v30, %v954_v47  ;;  %v1027_v36 = vld [vmem:[%s1762_s28 + $0x68] sm:$0xff] }
 0x3b6   : > { %1062 = vst.msk [vmem:[%s1776_s9] sm:$0xff] %vm422_vm0, %v1046_v38  ;;  %v1049_v50 = vmax.f32 %v1033_v51, 0.0  ;;  %v1031_v54 = vadd.f32 %v1015_v48, %v955_v45  ;;  %v1332_v55 = vpop.f32.mrf.mxu1 }
 0x3b7   : > { %v976_v59 = vadd.f32 %v1332_v55, %v1767_v30 }
 0x3b8   : > { %1065 = vst.msk [vmem:[%s1776_s9 + $0x18] sm:$0xff] %vm422_vm0, %v1049_v50  ;;  %v1047_v49 = vmax.f32 %v1031_v54, 0.0  ;;  %v967_v52 = vpop.f32.mrf.mxu1 }
 0x3b9   : > { %v1036_v62 = vadd.f32 %v1020_v58, %v976_v59  ;;  %v968_v63 = vadd.f32 %v1767_v30, %v967_v52 }
 0x3ba   : > { %1063 = vst.msk [vmem:[%s1776_s9 + $0x8] sm:$0xff] %vm422_vm0, %v1047_v49  ;;  %v1333_v0 = vpop.f32.mrf.mxu1 }
 0x3bb   : > { %v1052_v53 = vmax.f32 %v1036_v62, 0.0  ;;  %v1034_v2 = vadd.f32 %v1018_v61, %v968_v63  ;;  %v979_v57 = vadd.f32 %v1333_v0, %v1767_v30 }
 0x3bc   : > { %v970_v3 = vpop.f32.mrf.mxu1 }
 0x3bd   : > { %1068 = vst.msk [vmem:[%s1776_s9 + $0x30] sm:$0xff] %vm422_vm0, %v1052_v53  ;;  %v1050_v5 = vmax.f32 %v1034_v2, 0.0  ;;  %v1037_v56 = vadd.f32 %v1021_v1, %v979_v57  ;;  %v971_v60 = vadd.f32 %v1767_v30, %v970_v3 }
 0x3be   : > { %v1336_v6 = vpop.f32.mrf.mxu1 }
 0x3bf   : > { %1066 = vst.msk [vmem:[%s1776_s9 + $0x20] sm:$0xff] %vm422_vm0, %v1050_v5  ;;  %v1053_v9 = vmax.f32 %v1037_v56, 0.0  ;;  %v1035_v10 = vadd.f32 %v1019_v4, %v971_v60  ;;  %v992_v12 = vadd.f32 %v1336_v6, %v1767_v30 }
 0x3c0   : > { %v983_v13 = vpop.f32.mrf.mxu1 }
 0x3c1   : > { %1069 = vst.msk [vmem:[%s1776_s9 + $0x38] sm:$0xff] %vm422_vm0, %v1053_v9  ;;  %v1051_v15 = vmax.f32 %v1035_v10, 0.0  ;;  %v1040_v17 = vadd.f32 %v1024_v8, %v992_v12  ;;  %v984_v18 = vadd.f32 %v1767_v30, %v983_v13 }
 0x3c2   : > { %v1337_v19 = vpop.f32.mrf.mxu1 }
 0x3c3   : > { %1067 = vst.msk [vmem:[%s1776_s9 + $0x28] sm:$0xff] %vm422_vm0, %v1051_v15  ;;  %v1056_v22 = vmax.f32 %v1040_v17, 0.0  ;;  %v1038_v23 = vadd.f32 %v1022_v14, %v984_v18  ;;  %v995_v24 = vadd.f32 %v1337_v19, %v1767_v30 }
 0x3c4   : > { %v986_v25 = vpop.f32.mrf.mxu1 }
 0x3c5   : > { %1072 = vst.msk [vmem:[%s1776_s9 + $0x50] sm:$0xff] %vm422_vm0, %v1056_v22  ;;  %v1054_v7 = vmax.f32 %v1038_v23, 0.0  ;;  %v1041_v28 = vadd.f32 %v1025_v20, %v995_v24  ;;  %v987_v16 = vadd.f32 %v1767_v30, %v986_v25 }
 0x3c6   : > { %v1340_v29 = vpop.f32.mrf.mxu1 }
 0x3c7   : > { %1070 = vst.msk [vmem:[%s1776_s9 + $0x40] sm:$0xff] %vm422_vm0, %v1054_v7  ;;  %v1057_v11 = vmax.f32 %v1041_v28, 0.0  ;;  %v1039_v32 = vadd.f32 %v1023_v27, %v987_v16  ;;  %v1008_v21 = vadd.f32 %v1340_v29, %v1767_v30 }
 0x3c8   : > { %v999_v33 = vpop.f32.mrf.mxu1 }
 0x3c9   : > { %1073 = vst.msk [vmem:[%s1776_s9 + $0x58] sm:$0xff] %vm422_vm0, %v1057_v11  ;;  %v1055_v40 = vmax.f32 %v1039_v32, 0.0  ;;  %v1044_v41 = vadd.f32 %v1028_v31, %v1008_v21  ;;  %v1000_v26 = vadd.f32 %v1767_v30, %v999_v33 }
 0x3ca   : > { %v1341_v42 = vpop.f32.mrf.mxu1 }
 0x3cb   : > { %1071 = vst.msk [vmem:[%s1776_s9 + $0x48] sm:$0xff] %vm422_vm0, %v1055_v40  ;;  %v1060_v43 = vmax.f32 %v1044_v41, 0.0  ;;  %v1042_v44 = vadd.f32 %v1026_v35, %v1000_v26  ;;  %v1011_v34 = vadd.f32 %v1341_v42, %v1767_v30 }
 0x3cc   : > { %v1002_v46 = vpop.f32.mrf.mxu1 }
 0x3cd   : > { %1076 = vst.msk [vmem:[%s1776_s9 + $0x70] sm:$0xff] %vm422_vm0, %v1060_v43  ;;  %v1058_v39 = vmax.f32 %v1042_v44, 0.0  ;;  %v1045_v47 = vadd.f32 %v1029_v37, %v1011_v34  ;;  %v1003_v48 = vadd.f32 %v1767_v30, %v1002_v46 }
 0x3cf   : > { %1074 = vst.msk [vmem:[%s1776_s9 + $0x60] sm:$0xff] %vm422_vm0, %v1058_v39  ;;  %v1061_v38 = vmax.f32 %v1045_v47, 0.0  ;;  %v1043_v51 = vadd.f32 %v1027_v36, %v1003_v48 }
 0x3d1   : > { %1077 = vst.msk [vmem:[%s1776_s9 + $0x78] sm:$0xff] %vm422_vm0, %v1061_v38  ;;  %v1059_v45 = vmax.f32 %v1043_v51, 0.0 }
 0x3d3   : > { %1075 = vst.msk [vmem:[%s1776_s9 + $0x68] sm:$0xff] %vm422_vm0, %v1059_v45 }
 0x3d4 PF: > { %s16_s25 = sadd.s32 1, %s1498_s25   ;;  %s1860_s21 = smov %s1490_s23 }
 0x3d5   : > { %p13_p7 = scmp.ge.s32.totalorder %s16_s25, 6   ;;  %s1861_s22 = smov %s1494_s24 }
 0x3d6   : > { %s1862_s23 = smov %s1865_s26  ;;  %s1863_s24 = smov %s1869_s27 }
 0x3d7   :  { %15 = sbr.rel (!%p13_p7) target bundleno = 3 (0x3), region = 83 }

</bundles_post_ra>
